<compile_context>
chip_gen: v7x
topology: tpu7x:2x2x1
jax: 0.10.0
libtpu: 0.0.40
codegen_flags: <defaults>
</compile_context>

<pallas_src>
import functools

import jax
import jax.numpy as jnp
from jax.experimental import pallas as pl
from jax.experimental.pallas import tpu as pltpu

_PAD_LANES = 128  # aligned zero border on the flattened H*W axis (covers k<=5 halo)


def _relu(x):
    return jnp.maximum(x, 0.0)


def _hswish(x):
    return x * (jnp.minimum(jnp.maximum(x + 3.0, 0.0), 6.0) * (1.0 / 6.0))


def _hsigmoid(x):
    return jnp.minimum(jnp.maximum(x + 3.0, 0.0), 6.0) * (1.0 / 6.0)


def _make_kernel(H, W, k, nl, se, use_res):
    p = (k - 1) // 2
    HW = H * W
    nlin = _relu if nl == "RE" else _hswish

    def kernel(*refs):
        if se:
            (x_ref, w1_ref, b1_ref, wdw_ref, b2_ref, wse1_ref, wse2_ref,
             w3_ref, b3_ref, o_ref, ypad_ref) = refs
        else:
            (x_ref, w1_ref, b1_ref, wdw_ref, b2_ref,
             w3_ref, b3_ref, o_ref, ypad_ref) = refs

        exp = w1_ref.shape[0]
        oup = w3_ref.shape[0]

        x = x_ref[0]                                        # (Cin, H*W), lane-dense

        # ---- 1x1 expand + folded BN + nonlinearity (MXU, N = H*W) ----
        y1 = jnp.dot(w1_ref[...], x, preferred_element_type=jnp.float32)
        y1 = nlin(y1 + b1_ref[...])                         # (exp, HW)

        # ---- depthwise kxk (stride 1): flat zero-bordered VMEM scratch ----
        ypad_ref[...] = jnp.zeros_like(ypad_ref)
        ypad_ref[:, _PAD_LANES:_PAD_LANES + HW] = y1        # aligned interior store

        col = jax.lax.broadcasted_iota(jnp.int32, (1, HW), 1) % W
        wdw = wdw_ref[...]                                  # (exp, k*k), BN folded
        acc = jnp.zeros((exp, HW), jnp.float32)
        for kh in range(k):
            for kw in range(k):
                dh, dw = kh - p, kw - p
                d = dh * W + dw
                tap = ypad_ref[:, _PAD_LANES + d:_PAD_LANES + d + HW]
                if dw != 0:
                    # column wrap-around mask (row overflow hits the zero border)
                    valid = (col >= -dw) & (col <= W - 1 - dw)
                    tap = jnp.where(valid, tap, 0.0)
                t = kh * k + kw
                acc = acc + wdw[:, t:t + 1] * tap           # per-channel VPU FMA
        y2 = acc + b2_ref[...]                              # folded BN of dw conv

        # ---- squeeze-excite (optional), entirely in VMEM ----
        if se:
            pooled = jnp.mean(y2, axis=-1, keepdims=True)                      # (exp, 1)
            s = jnp.dot(wse1_ref[...], pooled, preferred_element_type=jnp.float32)
            s = jnp.dot(wse2_ref[...], jnp.maximum(s, 0.0),
                        preferred_element_type=jnp.float32)                    # (exp, 1)
            y2 = y2 * _hsigmoid(s)

        y2 = nlin(y2)

        # ---- 1x1 project + folded BN (+ residual), lane-dense output ----
        out = jnp.dot(w3_ref[...], y2, preferred_element_type=jnp.float32) + b3_ref[...]
        if use_res:
            out = out + x
        o_ref[...] = out.reshape(1, oup, HW).astype(o_ref.dtype)

    return kernel


@functools.partial(jax.jit, static_argnames=("kernel_size", "stride", "se", "nl"))
def mobile_bottleneck_forward(x_nchw, params, *, kernel_size=3, stride=1,
                              se=False, nl="RE"):
    """MobileBottleneck.forward (inference-mode BN).  NCHW in -> NCHW out."""
    assert kernel_size in (3, 5)
    assert nl in ("RE", "HS")
    if stride != 1:
        # TODO(synk): stride=2 depthwise path (strided output sampling) not implemented.
        raise NotImplementedError("only stride=1 is implemented in the Pallas kernel")

    B, cin, H, W = x_nchw.shape
    HW = H * W
    eps = 1e-5

    # TODO(synk): BatchNorm uses running stats (eval mode); training-mode batch
    # statistics are not implemented.
    def bn_fold(bn):
        gamma, beta, mean, var = bn
        scale = gamma * jax.lax.rsqrt(var + eps)
        return scale, beta - scale * mean

    s1, sh1 = bn_fold(params["bn1"])
    s2, sh2 = bn_fold(params["bn2"])
    s3, sh3 = bn_fold(params["bn3"])

    exp = params["w1"].shape[0]
    oup = params["w3"].shape[0]
    kk = kernel_size * kernel_size

    # Fold BN into conv weights / per-channel biases (tiny host-side glue).
    w1 = (params["w1"] * s1[:, None]).astype(jnp.float32)                  # (exp, cin)
    b1 = sh1[:, None].astype(jnp.float32)                                  # (exp, 1)
    wdw = (params["wdw"] * s2[:, None, None]).reshape(exp, kk).astype(jnp.float32)
    b2 = sh2[:, None].astype(jnp.float32)                                  # (exp, 1)
    w3 = (params["w3"] * s3[:, None]).astype(jnp.float32)                  # (oup, exp)
    b3 = sh3[:, None].astype(jnp.float32)                                  # (oup, 1)

    use_res = (stride == 1 and cin == oup)
    x_flat = x_nchw.reshape(B, cin, HW).astype(jnp.float32)  # lane-dense (C, H*W)

    const2 = lambda bi: (0, 0)
    inputs = [x_flat, w1, b1, wdw, b2]
    in_specs = [
        pl.BlockSpec((1, cin, HW), lambda bi: (bi, 0, 0)),
        pl.BlockSpec((exp, cin), const2),
        pl.BlockSpec((exp, 1), const2),
        pl.BlockSpec((exp, kk), const2),
        pl.BlockSpec((exp, 1), const2),
    ]
    if se:
        red = params["wse1"].shape[0]
        inputs += [params["wse1"].astype(jnp.float32),
                   params["wse2"].astype(jnp.float32)]
        in_specs += [pl.BlockSpec((red, exp), const2),
                     pl.BlockSpec((exp, red), const2)]
    inputs += [w3, b3]
    in_specs += [pl.BlockSpec((oup, exp), const2),
                 pl.BlockSpec((oup, 1), const2)]

    out_flat = pl.pallas_call(
        _make_kernel(H, W, kernel_size, nl, se, use_res),
        out_shape=jax.ShapeDtypeStruct((B, oup, HW), jnp.float32),
        grid=(B,),
        in_specs=in_specs,
        out_specs=pl.BlockSpec((1, oup, HW), lambda bi: (bi, 0, 0)),
        scratch_shapes=[pltpu.VMEM((exp, 2 * _PAD_LANES + HW), jnp.float32)],
        compiler_params=pltpu.CompilerParams(
            dimension_semantics=("parallel",),
        ),
    )(*inputs)
    # TODO(synk): for DB-scale images, add an H-tiled grid axis with a 1-row halo
    # instead of one whole-image block per batch element.
    return out_flat.reshape(B, oup, H, W)


def init_params(key, *, inp, oup, exp, kernel_size=3, se=False, reduction=4):
    ks = jax.random.split(key, 8)

    def bn_init(k, c):
        k1, k2, k3, k4 = jax.random.split(k, 4)
        return (1.0 + 0.1 * jax.random.normal(k1, (c,), jnp.float32),   # gamma
                0.1 * jax.random.normal(k2, (c,), jnp.float32),         # beta
                0.1 * jax.random.normal(k3, (c,), jnp.float32),         # running mean
                1.0 + 0.1 * jnp.abs(jax.random.normal(k4, (c,), jnp.float32)))  # var

    params = {
        "w1": 0.3 * jax.random.normal(ks[0], (exp, inp), jnp.float32),
        "bn1": bn_init(ks[1], exp),
        "wdw": 0.3 * jax.random.normal(ks[2], (exp, kernel_size, kernel_size), jnp.float32),
        "bn2": bn_init(ks[3], exp),
        "w3": 0.3 * jax.random.normal(ks[4], (oup, exp), jnp.float32),
        "bn3": bn_init(ks[5], oup),
    }
    if se:
        params["wse1"] = 0.3 * jax.random.normal(ks[6], (exp // reduction, exp), jnp.float32)
        params["wse2"] = 0.3 * jax.random.normal(ks[7], (exp, exp // reduction), jnp.float32)
    return params


def _reference_forward(x, params, *, kernel_size=3, stride=1, se=False, nl="RE"):
    """Pure-JAX reference (XLA convs) for a correctness sanity check."""
    eps = 1e-5
    nlin = _relu if nl == "RE" else _hswish

    def bn(y, bnp):
        gamma, beta, mean, var = bnp
        inv = jax.lax.rsqrt(var + eps)
        return ((y - mean[None, :, None, None]) * (gamma * inv)[None, :, None, None]
                + beta[None, :, None, None])

    exp = params["w1"].shape[0]
    oup = params["w3"].shape[0]
    p = (kernel_size - 1) // 2

    y = jnp.einsum("oi,bihw->bohw", params["w1"], x)
    y = nlin(bn(y, params["bn1"]))

    wdw = params["wdw"][:, None, :, :]                                   # (exp,1,k,k)
    y = jax.lax.conv_general_dilated(
        y, wdw, window_strides=(stride, stride), padding=((p, p), (p, p)),
        dimension_numbers=("NCHW", "OIHW", "NCHW"), feature_group_count=exp)
    y = bn(y, params["bn2"])
    if se:
        pooled = jnp.mean(y, axis=(2, 3))                                # (B, exp)
        s = _relu(pooled @ params["wse1"].T)
        s = _hsigmoid(s @ params["wse2"].T)
        y = y * s[:, :, None, None]
    y = nlin(y)
    out = bn(jnp.einsum("oi,bihw->bohw", params["w3"], y), params["bn3"])
    if stride == 1 and x.shape[1] == oup:
        out = out + x
    return out


if __name__ == "__main__":
    key = jax.random.PRNGKey(0)
    kx, kp = jax.random.split(key)

    # MobileBottleneck(inp=8, oup=8, kernel=3, stride=1, exp=32, se=True, nl='HS')
    B, INP, H, W = 2, 8, 16, 16
    OUP, EXP, K = 8, 32, 3
    SE, NL, STRIDE = True, "HS", 1

    x = jax.random.normal(kx, (B, INP, H, W), jnp.float32)
    params = init_params(kp, inp=INP, oup=OUP, exp=EXP, kernel_size=K, se=SE)

    out = mobile_bottleneck_forward(x, params, kernel_size=K, stride=STRIDE, se=SE, nl=NL)
    out = jax.block_until_ready(out)

    ref = jax.block_until_ready(
        _reference_forward(x, params, kernel_size=K, stride=STRIDE, se=SE, nl=NL))

    assert out.shape == (B, OUP, H, W), out.shape
    max_err = float(jnp.max(jnp.abs(out - ref)))
    assert jnp.allclose(out, ref, atol=5e-3, rtol=5e-3), f"mismatch vs reference: {max_err}"

    print("KERNEL_OK")
</pallas_src>

<mosaic_0001>
module attributes {stable_mosaic.version = 11 : i64} {
  func.func @kernel(%arg0: i32, %arg1: memref<1x8x256xf32, #tpu.memory_space<vmem>>, %arg2: memref<32x8xf32, #tpu.memory_space<vmem>>, %arg3: memref<32x1xf32, #tpu.memory_space<vmem>>, %arg4: memref<32x9xf32, #tpu.memory_space<vmem>>, %arg5: memref<32x1xf32, #tpu.memory_space<vmem>>, %arg6: memref<8x32xf32, #tpu.memory_space<vmem>>, %arg7: memref<32x8xf32, #tpu.memory_space<vmem>>, %arg8: memref<8x32xf32, #tpu.memory_space<vmem>>, %arg9: memref<8x1xf32, #tpu.memory_space<vmem>>, %arg10: memref<1x8x256xf32, #tpu.memory_space<vmem>>, %arg11: memref<32x512xf32, #tpu.memory_space<vmem>>) attributes {dimension_semantics = [#tpu.dimension_semantics<parallel>], iteration_bounds = array<i64: 2>, scalar_prefetch = 0 : i64, scratch_operands = 1 : i64, tpu.core_type = #tpu.core_type<tc>, window_params = [{transform_indices = @transform_0, window_bounds = array<i64: 1, 8, 256>}, {pipeline_mode = #tpu.pipeline_mode<synchronous>, transform_indices = @transform_1, window_bounds = array<i64: 32, 8>}, {pipeline_mode = #tpu.pipeline_mode<synchronous>, transform_indices = @transform_2, window_bounds = array<i64: 32, 1>}, {pipeline_mode = #tpu.pipeline_mode<synchronous>, transform_indices = @transform_3, window_bounds = array<i64: 32, 9>}, {pipeline_mode = #tpu.pipeline_mode<synchronous>, transform_indices = @transform_4, window_bounds = array<i64: 32, 1>}, {pipeline_mode = #tpu.pipeline_mode<synchronous>, transform_indices = @transform_5, window_bounds = array<i64: 8, 32>}, {pipeline_mode = #tpu.pipeline_mode<synchronous>, transform_indices = @transform_6, window_bounds = array<i64: 32, 8>}, {pipeline_mode = #tpu.pipeline_mode<synchronous>, transform_indices = @transform_7, window_bounds = array<i64: 8, 32>}, {pipeline_mode = #tpu.pipeline_mode<synchronous>, transform_indices = @transform_8, window_bounds = array<i64: 8, 1>}, {transform_indices = @transform_9, window_bounds = array<i64: 1, 8, 256>}]} {
    %c0 = arith.constant 0 : index
    %c0_0 = arith.constant 0 : index
    %c0_1 = arith.constant 0 : index
    %0 = vector.load %arg1[%c0, %c0_0, %c0_1] : memref<1x8x256xf32, #tpu.memory_space<vmem>>, vector<1x8x256xf32>
    %1 = vector.shape_cast %0 : vector<1x8x256xf32> to vector<8x256xf32>
    %c0_2 = arith.constant 0 : index
    %c0_3 = arith.constant 0 : index
    %2 = vector.load %arg2[%c0_2, %c0_3] : memref<32x8xf32, #tpu.memory_space<vmem>>, vector<32x8xf32>
    %cst = arith.constant dense<0.000000e+00> : vector<32x256xf32>
    %3 = tpu.matmul %2, %1, %cst {dimension_numbers = #tpu.dot_dimension_numbers<[1], [0], [0], [1], [0, 0, 1, 1], [], []>} : vector<32x8xf32>, vector<8x256xf32>, vector<32x256xf32> -> vector<32x256xf32>
    %c0_4 = arith.constant 0 : index
    %c0_5 = arith.constant 0 : index
    %4 = vector.load %arg3[%c0_4, %c0_5] : memref<32x1xf32, #tpu.memory_space<vmem>>, vector<32x1xf32>
    %5 = vector.broadcast %4 : vector<32x1xf32> to vector<32x256xf32>
    %6 = arith.addf %3, %5 : vector<32x256xf32>
    %cst_6 = arith.constant 3.000000e+00 : f32
    %7 = vector.broadcast %cst_6 : f32 to vector<32x256xf32>
    %8 = arith.addf %6, %7 : vector<32x256xf32>
    %cst_7 = arith.constant 0.000000e+00 : f32
    %9 = vector.broadcast %cst_7 : f32 to vector<32x256xf32>
    %10 = arith.maximumf %8, %9 : vector<32x256xf32>
    %cst_8 = arith.constant 6.000000e+00 : f32
    %11 = vector.broadcast %cst_8 : f32 to vector<32x256xf32>
    %12 = arith.minimumf %10, %11 : vector<32x256xf32>
    %cst_9 = arith.constant 0.166666672 : f32
    %13 = vector.broadcast %cst_9 : f32 to vector<32x256xf32>
    %14 = arith.mulf %12, %13 : vector<32x256xf32>
    %15 = arith.mulf %6, %14 : vector<32x256xf32>
    %cst_10 = arith.constant 0.000000e+00 : f32
    %16 = vector.broadcast %cst_10 : f32 to vector<32x512xf32>
    %c0_11 = arith.constant 0 : index
    %c0_12 = arith.constant 0 : index
    %17 = vector.load %arg11[%c0_11, %c0_12] : memref<32x512xf32, #tpu.memory_space<vmem>>, vector<32x512xf32>
    tpu.vector_store %arg11[%c0_11, %c0_12], %16 {strides = array<i32>} : memref<32x512xf32, #tpu.memory_space<vmem>>, vector<32x512xf32>,
    %c0_13 = arith.constant 0 : index
    %c128 = arith.constant 128 : index
    %18 = vector.load %arg11[%c0_13, %c128] : memref<32x512xf32, #tpu.memory_space<vmem>>, vector<32x256xf32>
    tpu.vector_store %arg11[%c0_13, %c128], %15 {strides = array<i32>} : memref<32x512xf32, #tpu.memory_space<vmem>>, vector<32x256xf32>,
    %19 = tpu.iota {dimensions = array<i32: 1>} : vector<1x256xi32>
    %c16_i32 = arith.constant 16 : i32
    %c0_i32 = arith.constant 0 : i32
    %20 = arith.cmpi eq, %c16_i32, %c0_i32 : i32
    %c1_i32 = arith.constant 1 : i32
    %21 = arith.select %20, %c1_i32, %c16_i32 : i32
    %22 = vector.broadcast %21 : i32 to vector<1x256xi32>
    %23 = arith.remsi %19, %22 : vector<1x256xi32>
    %c0_i32_14 = arith.constant 0 : i32
    %24 = vector.broadcast %c0_i32_14 : i32 to vector<1x256xi32>
    %25 = arith.cmpi ne, %23, %24 : vector<1x256xi32>
    %c0_i32_15 = arith.constant 0 : i32
    %26 = vector.broadcast %c0_i32_15 : i32 to vector<1x256xi32>
    %27 = arith.cmpi slt, %23, %26 : vector<1x256xi32>
    %c0_i32_16 = arith.constant 0 : i32
    %28 = arith.cmpi slt, %21, %c0_i32_16 : i32
    %29 = vector.broadcast %28 : i1 to vector<1x256xi1>
    %30 = vector.broadcast %29 : vector<1x256xi1> to vector<1x256xi1>
    %31 = arith.xori %27, %30 : vector<1x256xi1>
    %32 = arith.andi %31, %25 : vector<1x256xi1>
    %33 = vector.broadcast %21 : i32 to vector<1x256xi32>
    %34 = arith.addi %23, %33 : vector<1x256xi32>
    %35 = arith.select %32, %34, %23 : vector<1x256xi1>, vector<1x256xi32>
    %c0_17 = arith.constant 0 : index
    %c0_18 = arith.constant 0 : index
    %36 = vector.load %arg4[%c0_17, %c0_18] : memref<32x9xf32, #tpu.memory_space<vmem>>, vector<32x9xf32>
    %cst_19 = arith.constant 0.000000e+00 : f32
    %37 = vector.broadcast %cst_19 : f32 to vector<32x256xf32>
    %c0_20 = arith.constant 0 : index
    %c111 = arith.constant 111 : index
    %38 = vector.load %arg11[%c0_20, %c111] : memref<32x512xf32, #tpu.memory_space<vmem>>, vector<32x256xf32>
    %c1_i32_21 = arith.constant 1 : i32
    %39 = vector.broadcast %c1_i32_21 : i32 to vector<1x256xi32>
    %40 = arith.cmpi sge, %35, %39 : vector<1x256xi32>
    %c16_i32_22 = arith.constant 16 : i32
    %41 = vector.broadcast %c16_i32_22 : i32 to vector<1x256xi32>
    %42 = arith.cmpi sle, %35, %41 : vector<1x256xi32>
    %43 = arith.andi %40, %42 : vector<1x256xi1>
    %cst_23 = arith.constant 0.000000e+00 : f32
    %44 = vector.shape_cast %43 : vector<1x256xi1> to vector<1x256xi1>
    %45 = vector.broadcast %44 : vector<1x256xi1> to vector<32x256xi1>
    %46 = vector.broadcast %cst_23 : f32 to vector<32x256xf32>
    %47 = arith.select %45, %38, %46 : vector<32x256xi1>, vector<32x256xf32>
    %48 = vector.extract_strided_slice %36 {offsets = [0, 0], sizes = [32, 1], strides = [1, 1]} : vector<32x9xf32> to vector<32x1xf32>
    %49 = vector.broadcast %48 : vector<32x1xf32> to vector<32x256xf32>
    %50 = arith.mulf %49, %47 : vector<32x256xf32>
    %51 = arith.addf %37, %50 : vector<32x256xf32>
    %c0_24 = arith.constant 0 : index
    %c112 = arith.constant 112 : index
    %52 = vector.load %arg11[%c0_24, %c112] : memref<32x512xf32, #tpu.memory_space<vmem>>, vector<32x256xf32>
    %53 = vector.extract_strided_slice %36 {offsets = [0, 1], sizes = [32, 1], strides = [1, 1]} : vector<32x9xf32> to vector<32x1xf32>
    %54 = vector.broadcast %53 : vector<32x1xf32> to vector<32x256xf32>
    %55 = arith.mulf %54, %52 : vector<32x256xf32>
    %56 = arith.addf %51, %55 : vector<32x256xf32>
    %c0_25 = arith.constant 0 : index
    %c113 = arith.constant 113 : index
    %57 = vector.load %arg11[%c0_25, %c113] : memref<32x512xf32, #tpu.memory_space<vmem>>, vector<32x256xf32>
    %c-1_i32 = arith.constant -1 : i32
    %58 = vector.broadcast %c-1_i32 : i32 to vector<1x256xi32>
    %59 = arith.cmpi sge, %35, %58 : vector<1x256xi32>
    %c14_i32 = arith.constant 14 : i32
    %60 = vector.broadcast %c14_i32 : i32 to vector<1x256xi32>
    %61 = arith.cmpi sle, %35, %60 : vector<1x256xi32>
    %62 = arith.andi %59, %61 : vector<1x256xi1>
    %cst_26 = arith.constant 0.000000e+00 : f32
    %63 = vector.shape_cast %62 : vector<1x256xi1> to vector<1x256xi1>
    %64 = vector.broadcast %63 : vector<1x256xi1> to vector<32x256xi1>
    %65 = vector.broadcast %cst_26 : f32 to vector<32x256xf32>
    %66 = arith.select %64, %57, %65 : vector<32x256xi1>, vector<32x256xf32>
    %67 = vector.extract_strided_slice %36 {offsets = [0, 2], sizes = [32, 1], strides = [1, 1]} : vector<32x9xf32> to vector<32x1xf32>
    %68 = vector.broadcast %67 : vector<32x1xf32> to vector<32x256xf32>
    %69 = arith.mulf %68, %66 : vector<32x256xf32>
    %70 = arith.addf %56, %69 : vector<32x256xf32>
    %c0_27 = arith.constant 0 : index
    %c127 = arith.constant 127 : index
    %71 = vector.load %arg11[%c0_27, %c127] : memref<32x512xf32, #tpu.memory_space<vmem>>, vector<32x256xf32>
    %c1_i32_28 = arith.constant 1 : i32
    %72 = vector.broadcast %c1_i32_28 : i32 to vector<1x256xi32>
    %73 = arith.cmpi sge, %35, %72 : vector<1x256xi32>
    %c16_i32_29 = arith.constant 16 : i32
    %74 = vector.broadcast %c16_i32_29 : i32 to vector<1x256xi32>
    %75 = arith.cmpi sle, %35, %74 : vector<1x256xi32>
    %76 = arith.andi %73, %75 : vector<1x256xi1>
    %cst_30 = arith.constant 0.000000e+00 : f32
    %77 = vector.shape_cast %76 : vector<1x256xi1> to vector<1x256xi1>
    %78 = vector.broadcast %77 : vector<1x256xi1> to vector<32x256xi1>
    %79 = vector.broadcast %cst_30 : f32 to vector<32x256xf32>
    %80 = arith.select %78, %71, %79 : vector<32x256xi1>, vector<32x256xf32>
    %81 = vector.extract_strided_slice %36 {offsets = [0, 3], sizes = [32, 1], strides = [1, 1]} : vector<32x9xf32> to vector<32x1xf32>
    %82 = vector.broadcast %81 : vector<32x1xf32> to vector<32x256xf32>
    %83 = arith.mulf %82, %80 : vector<32x256xf32>
    %84 = arith.addf %70, %83 : vector<32x256xf32>
    %c0_31 = arith.constant 0 : index
    %c128_32 = arith.constant 128 : index
    %85 = vector.load %arg11[%c0_31, %c128_32] : memref<32x512xf32, #tpu.memory_space<vmem>>, vector<32x256xf32>
    %86 = vector.extract_strided_slice %36 {offsets = [0, 4], sizes = [32, 1], strides = [1, 1]} : vector<32x9xf32> to vector<32x1xf32>
    %87 = vector.broadcast %86 : vector<32x1xf32> to vector<32x256xf32>
    %88 = arith.mulf %87, %85 : vector<32x256xf32>
    %89 = arith.addf %84, %88 : vector<32x256xf32>
    %c0_33 = arith.constant 0 : index
    %c129 = arith.constant 129 : index
    %90 = vector.load %arg11[%c0_33, %c129] : memref<32x512xf32, #tpu.memory_space<vmem>>, vector<32x256xf32>
    %c-1_i32_34 = arith.constant -1 : i32
    %91 = vector.broadcast %c-1_i32_34 : i32 to vector<1x256xi32>
    %92 = arith.cmpi sge, %35, %91 : vector<1x256xi32>
    %c14_i32_35 = arith.constant 14 : i32
    %93 = vector.broadcast %c14_i32_35 : i32 to vector<1x256xi32>
    %94 = arith.cmpi sle, %35, %93 : vector<1x256xi32>
    %95 = arith.andi %92, %94 : vector<1x256xi1>
    %cst_36 = arith.constant 0.000000e+00 : f32
    %96 = vector.shape_cast %95 : vector<1x256xi1> to vector<1x256xi1>
    %97 = vector.broadcast %96 : vector<1x256xi1> to vector<32x256xi1>
    %98 = vector.broadcast %cst_36 : f32 to vector<32x256xf32>
    %99 = arith.select %97, %90, %98 : vector<32x256xi1>, vector<32x256xf32>
    %100 = vector.extract_strided_slice %36 {offsets = [0, 5], sizes = [32, 1], strides = [1, 1]} : vector<32x9xf32> to vector<32x1xf32>
    %101 = vector.broadcast %100 : vector<32x1xf32> to vector<32x256xf32>
    %102 = arith.mulf %101, %99 : vector<32x256xf32>
    %103 = arith.addf %89, %102 : vector<32x256xf32>
    %c0_37 = arith.constant 0 : index
    %c143 = arith.constant 143 : index
    %104 = vector.load %arg11[%c0_37, %c143] : memref<32x512xf32, #tpu.memory_space<vmem>>, vector<32x256xf32>
    %c1_i32_38 = arith.constant 1 : i32
    %105 = vector.broadcast %c1_i32_38 : i32 to vector<1x256xi32>
    %106 = arith.cmpi sge, %35, %105 : vector<1x256xi32>
    %c16_i32_39 = arith.constant 16 : i32
    %107 = vector.broadcast %c16_i32_39 : i32 to vector<1x256xi32>
    %108 = arith.cmpi sle, %35, %107 : vector<1x256xi32>
    %109 = arith.andi %106, %108 : vector<1x256xi1>
    %cst_40 = arith.constant 0.000000e+00 : f32
    %110 = vector.shape_cast %109 : vector<1x256xi1> to vector<1x256xi1>
    %111 = vector.broadcast %110 : vector<1x256xi1> to vector<32x256xi1>
    %112 = vector.broadcast %cst_40 : f32 to vector<32x256xf32>
    %113 = arith.select %111, %104, %112 : vector<32x256xi1>, vector<32x256xf32>
    %114 = vector.extract_strided_slice %36 {offsets = [0, 6], sizes = [32, 1], strides = [1, 1]} : vector<32x9xf32> to vector<32x1xf32>
    %115 = vector.broadcast %114 : vector<32x1xf32> to vector<32x256xf32>
    %116 = arith.mulf %115, %113 : vector<32x256xf32>
    %117 = arith.addf %103, %116 : vector<32x256xf32>
    %c0_41 = arith.constant 0 : index
    %c144 = arith.constant 144 : index
    %118 = vector.load %arg11[%c0_41, %c144] : memref<32x512xf32, #tpu.memory_space<vmem>>, vector<32x256xf32>
    %119 = vector.extract_strided_slice %36 {offsets = [0, 7], sizes = [32, 1], strides = [1, 1]} : vector<32x9xf32> to vector<32x1xf32>
    %120 = vector.broadcast %119 : vector<32x1xf32> to vector<32x256xf32>
    %121 = arith.mulf %120, %118 : vector<32x256xf32>
    %122 = arith.addf %117, %121 : vector<32x256xf32>
    %c0_42 = arith.constant 0 : index
    %c145 = arith.constant 145 : index
    %123 = vector.load %arg11[%c0_42, %c145] : memref<32x512xf32, #tpu.memory_space<vmem>>, vector<32x256xf32>
    %c-1_i32_43 = arith.constant -1 : i32
    %124 = vector.broadcast %c-1_i32_43 : i32 to vector<1x256xi32>
    %125 = arith.cmpi sge, %35, %124 : vector<1x256xi32>
    %c14_i32_44 = arith.constant 14 : i32
    %126 = vector.broadcast %c14_i32_44 : i32 to vector<1x256xi32>
    %127 = arith.cmpi sle, %35, %126 : vector<1x256xi32>
    %128 = arith.andi %125, %127 : vector<1x256xi1>
    %cst_45 = arith.constant 0.000000e+00 : f32
    %129 = vector.shape_cast %128 : vector<1x256xi1> to vector<1x256xi1>
    %130 = vector.broadcast %129 : vector<1x256xi1> to vector<32x256xi1>
    %131 = vector.broadcast %cst_45 : f32 to vector<32x256xf32>
    %132 = arith.select %130, %123, %131 : vector<32x256xi1>, vector<32x256xf32>
    %133 = vector.extract_strided_slice %36 {offsets = [0, 8], sizes = [32, 1], strides = [1, 1]} : vector<32x9xf32> to vector<32x1xf32>
    %134 = vector.broadcast %133 : vector<32x1xf32> to vector<32x256xf32>
    %135 = arith.mulf %134, %132 : vector<32x256xf32>
    %136 = arith.addf %122, %135 : vector<32x256xf32>
    %c0_46 = arith.constant 0 : index
    %c0_47 = arith.constant 0 : index
    %137 = vector.load %arg5[%c0_46, %c0_47] : memref<32x1xf32, #tpu.memory_space<vmem>>, vector<32x1xf32>
    %138 = vector.broadcast %137 : vector<32x1xf32> to vector<32x256xf32>
    %139 = arith.addf %136, %138 : vector<32x256xf32>
    %cst_48 = arith.constant dense<0.000000e+00> : vector<32xf32>
    %140 = vector.multi_reduction <add>, %139, %cst_48 [1] : vector<32x256xf32> to vector<32xf32>
    %141 = vector.shape_cast %140 : vector<32xf32> to vector<32x1xf32>
    %cst_49 = arith.constant 2.560000e+02 : f32
    %142 = vector.broadcast %cst_49 : f32 to vector<32x1xf32>
    %143 = arith.divf %141, %142 : vector<32x1xf32>
    %c0_50 = arith.constant 0 : index
    %c0_51 = arith.constant 0 : index
    %144 = vector.load %arg6[%c0_50, %c0_51] : memref<8x32xf32, #tpu.memory_space<vmem>>, vector<8x32xf32>
    %cst_52 = arith.constant dense<0.000000e+00> : vector<8x1xf32>
    %145 = tpu.matmul %144, %143, %cst_52 {dimension_numbers = #tpu.dot_dimension_numbers<[1], [0], [0], [1], [0, 0, 1, 1], [], []>} : vector<8x32xf32>, vector<32x1xf32>, vector<8x1xf32> -> vector<8x1xf32>
    %c0_53 = arith.constant 0 : index
    %c0_54 = arith.constant 0 : index
    %146 = vector.load %arg7[%c0_53, %c0_54] : memref<32x8xf32, #tpu.memory_space<vmem>>, vector<32x8xf32>
    %cst_55 = arith.constant 0.000000e+00 : f32
    %147 = vector.broadcast %cst_55 : f32 to vector<8x1xf32>
    %148 = arith.maximumf %145, %147 : vector<8x1xf32>
    %cst_56 = arith.constant dense<0.000000e+00> : vector<32x1xf32>
    %149 = tpu.matmul %146, %148, %cst_56 {dimension_numbers = #tpu.dot_dimension_numbers<[1], [0], [0], [1], [0, 0, 1, 1], [], []>} : vector<32x8xf32>, vector<8x1xf32>, vector<32x1xf32> -> vector<32x1xf32>
    %cst_57 = arith.constant 3.000000e+00 : f32
    %150 = vector.broadcast %cst_57 : f32 to vector<32x1xf32>
    %151 = arith.addf %149, %150 : vector<32x1xf32>
    %cst_58 = arith.constant 0.000000e+00 : f32
    %152 = vector.broadcast %cst_58 : f32 to vector<32x1xf32>
    %153 = arith.maximumf %151, %152 : vector<32x1xf32>
    %cst_59 = arith.constant 6.000000e+00 : f32
    %154 = vector.broadcast %cst_59 : f32 to vector<32x1xf32>
    %155 = arith.minimumf %153, %154 : vector<32x1xf32>
    %cst_60 = arith.constant 0.166666672 : f32
    %156 = vector.broadcast %cst_60 : f32 to vector<32x1xf32>
    %157 = arith.mulf %155, %156 : vector<32x1xf32>
    %158 = vector.broadcast %157 : vector<32x1xf32> to vector<32x256xf32>
    %159 = arith.mulf %139, %158 : vector<32x256xf32>
    %cst_61 = arith.constant 3.000000e+00 : f32
    %160 = vector.broadcast %cst_61 : f32 to vector<32x256xf32>
    %161 = arith.addf %159, %160 : vector<32x256xf32>
    %cst_62 = arith.constant 0.000000e+00 : f32
    %162 = vector.broadcast %cst_62 : f32 to vector<32x256xf32>
    %163 = arith.maximumf %161, %162 : vector<32x256xf32>
    %cst_63 = arith.constant 6.000000e+00 : f32
    %164 = vector.broadcast %cst_63 : f32 to vector<32x256xf32>
    %165 = arith.minimumf %163, %164 : vector<32x256xf32>
    %cst_64 = arith.constant 0.166666672 : f32
    %166 = vector.broadcast %cst_64 : f32 to vector<32x256xf32>
    %167 = arith.mulf %165, %166 : vector<32x256xf32>
    %168 = arith.mulf %159, %167 : vector<32x256xf32>
    %c0_65 = arith.constant 0 : index
    %c0_66 = arith.constant 0 : index
    %169 = vector.load %arg8[%c0_65, %c0_66] : memref<8x32xf32, #tpu.memory_space<vmem>>, vector<8x32xf32>
    %cst_67 = arith.constant dense<0.000000e+00> : vector<8x256xf32>
    %170 = tpu.matmul %169, %168, %cst_67 {dimension_numbers = #tpu.dot_dimension_numbers<[1], [0], [0], [1], [0, 0, 1, 1], [], []>} : vector<8x32xf32>, vector<32x256xf32>, vector<8x256xf32> -> vector<8x256xf32>
    %c0_68 = arith.constant 0 : index
    %c0_69 = arith.constant 0 : index
    %171 = vector.load %arg9[%c0_68, %c0_69] : memref<8x1xf32, #tpu.memory_space<vmem>>, vector<8x1xf32>
    %172 = vector.broadcast %171 : vector<8x1xf32> to vector<8x256xf32>
    %173 = arith.addf %170, %172 : vector<8x256xf32>
    %174 = arith.addf %173, %1 : vector<8x256xf32>
    %175 = vector.shape_cast %174 : vector<8x256xf32> to vector<1x8x256xf32>
    %c0_70 = arith.constant 0 : index
    %c0_71 = arith.constant 0 : index
    %c0_72 = arith.constant 0 : index
    %176 = vector.load %arg10[%c0_70, %c0_71, %c0_72] : memref<1x8x256xf32, #tpu.memory_space<vmem>>, vector<1x8x256xf32>
    tpu.vector_store %arg10[%c0_70, %c0_71, %c0_72], %175 {strides = array<i32>} : memref<1x8x256xf32, #tpu.memory_space<vmem>>, vector<1x8x256xf32>,
    return
  }
  func.func @transform_0(%arg0: i32) -> (i32, i32, i32) {
    %c0_i32 = arith.constant 0 : i32
    %c0_i32_0 = arith.constant 0 : i32
    %c0_i32_1 = arith.constant 0 : i32
    return %arg0, %c0_i32, %c0_i32_0 : i32, i32, i32
  }
  func.func @transform_1(%arg0: i32) -> (i32, i32) {
    %c0_i32 = arith.constant 0 : i32
    %c0_i32_0 = arith.constant 0 : i32
    %c0_i32_1 = arith.constant 0 : i32
    return %c0_i32, %c0_i32_0 : i32, i32
  }
  func.func @transform_2(%arg0: i32) -> (i32, i32) {
    %c0_i32 = arith.constant 0 : i32
    %c0_i32_0 = arith.constant 0 : i32
    %c0_i32_1 = arith.constant 0 : i32
    return %c0_i32, %c0_i32_0 : i32, i32
  }
  func.func @transform_3(%arg0: i32) -> (i32, i32) {
    %c0_i32 = arith.constant 0 : i32
    %c0_i32_0 = arith.constant 0 : i32
    %c0_i32_1 = arith.constant 0 : i32
    return %c0_i32, %c0_i32_0 : i32, i32
  }
  func.func @transform_4(%arg0: i32) -> (i32, i32) {
    %c0_i32 = arith.constant 0 : i32
    %c0_i32_0 = arith.constant 0 : i32
    %c0_i32_1 = arith.constant 0 : i32
    return %c0_i32, %c0_i32_0 : i32, i32
  }
  func.func @transform_5(%arg0: i32) -> (i32, i32) {
    %c0_i32 = arith.constant 0 : i32
    %c0_i32_0 = arith.constant 0 : i32
    %c0_i32_1 = arith.constant 0 : i32
    return %c0_i32, %c0_i32_0 : i32, i32
  }
  func.func @transform_6(%arg0: i32) -> (i32, i32) {
    %c0_i32 = arith.constant 0 : i32
    %c0_i32_0 = arith.constant 0 : i32
    %c0_i32_1 = arith.constant 0 : i32
    return %c0_i32, %c0_i32_0 : i32, i32
  }
  func.func @transform_7(%arg0: i32) -> (i32, i32) {
    %c0_i32 = arith.constant 0 : i32
    %c0_i32_0 = arith.constant 0 : i32
    %c0_i32_1 = arith.constant 0 : i32
    return %c0_i32, %c0_i32_0 : i32, i32
  }
  func.func @transform_8(%arg0: i32) -> (i32, i32) {
    %c0_i32 = arith.constant 0 : i32
    %c0_i32_0 = arith.constant 0 : i32
    %c0_i32_1 = arith.constant 0 : i32
    return %c0_i32, %c0_i32_0 : i32, i32
  }
  func.func @transform_9(%arg0: i32) -> (i32, i32, i32) {
    %c0_i32 = arith.constant 0 : i32
    %c0_i32_0 = arith.constant 0 : i32
    %c0_i32_1 = arith.constant 0 : i32
    return %arg0, %c0_i32, %c0_i32_0 : i32, i32, i32
  }
}

</mosaic_0001>

<bundles_post_ra>
// kernel: mobile_bottleneck_forward.1
= control target key start
LH: loop header
LB: loop body
LE: loop exit
PB: predicated region body
PF: predicated region fallthrough
CT: control target
= control target key end

     0   :  { %s2034_s30 = smov 0   ;;  %s2887_s0 = inlined_call_operand.vmem [shape: f32[2,8,256], index: 0, kind: input, shape index: {}]   ;;  %s2888_s1 = inlined_call_operand.vmem [shape: f32[32,8], index: 1, kind: input, shape index: {}]   ;;  %s2889_s2 = inlined_call_operand.vmem [shape: f32[32,1], index: 2, kind: input, shape index: {}]   ;;  %s2890_s3 = inlined_call_operand.vmem [shape: f32[32,9], index: 3, kind: input, shape index: {}]   ;;  %s2891_s4 = inlined_call_operand.vmem [shape: f32[32,1], index: 4, kind: input, shape index: {}]   ;;  %s2892_s5 = inlined_call_operand.vmem [shape: f32[8,32], index: 5, kind: input, shape index: {}]   ;;  %s2893_s6 = inlined_call_operand.vmem [shape: f32[32,8], index: 6, kind: input, shape index: {}]   ;;  %s2894_s7 = inlined_call_operand.vmem [shape: f32[8,32], index: 7, kind: input, shape index: {}]   ;;  %s2895_s8 = inlined_call_operand.vmem [shape: f32[8,1], index: 8, kind: input, shape index: {}]   ;;  %s2896_s9 = inlined_call_operand.vmem [shape: f32[2,8,256], index: 9, kind: output, shape index: {}]  }
   0x1 LB: > { %s1774_s10 = sadd.s32 4294967295, %s1962_s30   ;;  %p1778_p0 = scmp.ge.s32.totalorder %s1962_s30, 1  ;;  %s1962_s30 = sphi %s2034_s30, %s19_s30  }
   0x2   : > { %p287_p1 = scmp.lt.s32.totalorder %s1962_s30, 3 }
   0x4   : > { %p288_p2 = pnand %p1778_p0, %p287_p1 }
   0x6   : > { %291 = sbr.rel (%p288_p2) target bundleno = 1486 (0x5ce), region = 56 }
   0xd   : > { %v341_v0 = vld [vmem:[%s2889_s2 + $0x10] sm:$0xff]  ;;  %p323_p3 = scmp.lt.s32.totalorder %s1774_s10, 1  ;;  %v2048_v1 = vld [vmem:[%s2890_s3] sm:$0xff]  ;;  %v1964_v2 = vmov 0   ;;  %v1965_v3 = vmov 1   ;;  %v342_v4 = vld [vmem:[%s2889_s2 + $0x18] sm:$0xff] }
   0xe   : > { %1868 = vset.pattern.permute.xlu1 %v1964_v2  ;;  %1869 = vset.pattern.permute.xlu0 %v1965_v3  ;;  %v2897_v5 = vmov 0.0   ;;  %v2061_v6 = vld [vmem:[%s2890_s3 + $0x18] sm:$0xff]  ;;  %v335_v9 = vld [vmem:[%s2888_s1] sm:$0xff]  ;;  %vm363_vm0 = vcmask 64512   ;;  %v2080_v10 = vld [vmem:[%s2890_s3 + $0x8] sm:$0xff]  ;;  %v1967_v12 = vmov 7  }
   0xf   : > { %355 = vperm.xlu1 %1868, %v341_v0   ;;  %s2960_s10 = smov (!%p323_p3, %s1774_s10), 1  ;;  %680 = vperm.xlu0 %1869, %v2048_v1   ;;  %v336_v11 = vld [vmem:[%s2888_s1 + $0x8] sm:$0xff]  ;;  %v2092_v13 = vld [vmem:[%s2890_s3 + $0x10] sm:$0xff]  ;;  %v1968_v15 = vmov 2   ;;  %v338_v16 = vld [vmem:[%s2888_s1 + $0x18] sm:$0xff]  ;;  %v1969_v17 = vmov 3  }
  0x10   : > { %440 = vmatprep.mubr.f32.mxu0 %v2897_v5  ;;  %s1795_s19 = sshll.u32 %s2960_s10, 4  ;;  %v337_v14 = vld [vmem:[%s2888_s1 + $0x10] sm:$0xff]  ;;  %v1970_v18 = vmov 4   ;;  %s1971_s16 = smov 17   ;;  %v1972_v19 = vmov 5   ;;  %v1973_v20 = vmov 6  }
  0x11   : > { %s2069_s22 = scalar_lea.vmem %s2887_s0, %s1795_s19  ;;  %v1974_v21 = vmov 8   ;;  %s1975_s17 = smov 113   ;;  %v339_v22 = vld [vmem:[%s2889_s2] sm:$0xff]  ;;  %v340_v23 = vld [vmem:[%s2889_s2 + $0x8] sm:$0xff]  ;;  %vm618_vm1 = vcmask 138240   ;;  %vm802_vm2 = vcmask 121856  }
  0x12   : > { %v334_v7 = vld [vmem:[%s2069_s22 + $0x8] sm:$0xff]  ;;  %v333_v8 = vld [vmem:[%s2069_s22] sm:$0xff]  ;;  %s1976_s18 = smov 15   ;;  %s1977_s25 = smov 1   ;;  %vm1020_vm4 = vcmask 1039360   ;;  %vm883_vm5 = vcmask 7168  }
  0x13   : > { %360 = vperm.xlu1 %1868, %v342_v4   ;;  %692 = vperm.xlu0 %1869, %v2061_v6   ;;  %s1978_s26 = smov 127   ;;  %s1979_s27 = smov 16   ;;  %v1328_v35 = vld [vmem:[%s2891_s4] sm:$0xff]  ;;  %v1329_v37 = vld [vmem:[%s2891_s4 + $0x8] sm:$0xff]  ;;  %vm1101_vm7 = vcmask 924672   ;;  %vm743_vm8 = vcmask 130048  }
  0x14   : > { %376 = vmatprep.subr.mxu0 %v334_v7  ;;  %s1980_s13 = smov 111   ;;  %s1981_s14 = smov 112   ;;  %vm1271_vm9 = vcmask 908288   ;;  %vm1222_vm12 = vcmask 916480   ;;  %vm1983_vm13 = vmmov 0   ;;  %vm1378_vm14 = vcmask 261120  }
  0x15   : > { %377 = vmatpush1.msra.mxu0 %v333_v8 }
  0x16   : > { %1783 = vmatmul.mubr.msk.f32.vlgmr.msra.gmra.mrb[0].mxu0 %vm363_vm0, %v335_v9 }
  0x17   : > { %1870 = vset.pattern.permute.xlu1 %v1965_v3  ;;  %446 = vmatprep.mubr.f32.mxu0 %v2897_v5 }
  0x18   : > { %684 = vperm.xlu1 %1870, %v2080_v10   ;;  %1872 = vset.pattern.permute.xlu0 %v1967_v12 }
  0x19   : > { %1163 = vperm.xlu0 %1872, %v2080_v10  }
  0x1a   : > { %1784 = vmatmul.mubr.msk.f32.gmra.mrb[2].mxu0 %vm363_vm0, %v336_v11 }
  0x1b   : > { %452 = vmatprep.mubr.f32.mxu0 %v2897_v5 }
  0x1c   : > { %688 = vperm.xlu1 %1870, %v2092_v13  }
  0x1d   : > { %1875 = vset.pattern.permute.xlu0 %v1968_v15 }
  0x1e   : > { %1785 = vmatmul.mubr.msk.f32.gmra.mrb[4].mxu0 %vm363_vm0, %v337_v14  ;;  %832 = vperm.xlu0 %1875, %v2080_v10  }
  0x1f   : > { %458 = vmatprep.mubr.f32.mxu0 %v2897_v5 }
  0x20   : > { %1871 = vset.pattern.permute.xlu1 %v1967_v12 }
  0x21   : > { %1159 = vperm.xlu1 %1871, %v2048_v1  }
  0x22   : > { %1786 = vmatmul.mubr.msk.f32.gmra.mrb[6].mxu0 %vm363_vm0, %v338_v16  ;;  %836 = vperm.xlu0 %1875, %v2092_v13  }
  0x23   : > { %1708 = vmatprep.mubr.f32.mxu0 %v2897_v5 }
  0x25   : > { %1167 = vperm.xlu1 %1871, %v2092_v13  }
  0x26   : > { %1883 = vset.pattern.permute.xlu0 %v1969_v17 }
  0x27   : > { %909 = vperm.xlu0 %1883, %v2048_v1  }
  0x29   : > { %1171 = vperm.xlu1 %1871, %v2061_v6  }
  0x2b   : > { %921 = vperm.xlu0 %1883, %v2061_v6  }
  0x2d   : > { %1873 = vset.pattern.permute.xlu1 %v1964_v2 }
  0x2e   : > { %650 = vperm.xlu1 %1873, %v2080_v10  }
  0x2f   : > { %1892 = vset.pattern.permute.xlu0 %v1970_v18 }
  0x30   : > { %945 = vperm.xlu0 %1892, %v2080_v10  }
  0x32   : > { %1874 = vset.pattern.permute.xlu1 %v1968_v15 }
  0x33   : > { %828 = vperm.xlu1 %1874, %v2048_v1  }
  0x34   : > { %1895 = vrot.lane.b32.xlu0 %v2897_v5, %s1971_s16 }
  0x37   : > { %1876 = vset.pattern.permute.xlu1 %v1964_v2 }
  0x38   : > { %949 = vperm.xlu0 %1892, %v2092_v13   ;;  %655 = vperm.xlu1 %1876, %v2092_v13  }
  0x3c   : > { %1912 = vset.pattern.permute.xlu0 %v1972_v19  ;;  %660 = vperm.xlu1 %1876, %v2061_v6  }
  0x3d   : > { %1058 = vperm.xlu0 %1912, %v2061_v6  }
  0x40   : > { %1877 = vset.pattern.permute.xlu1 %v1969_v17 }
  0x41   : > { %1913 = vset.pattern.permute.xlu0 %v1973_v20  ;;  %913 = vperm.xlu1 %1877, %v2080_v10  }
  0x42   : > { %1131 = vperm.xlu0 %1913, %v2080_v10  }
  0x45   : > { %1879 = vrot.lane.b32.xlu1 %v2897_v5, %s1971_s16 }
  0x46   : > { %1135 = vperm.xlu0 %1913, %v2092_v13   ;;  %1884 = vset.pattern.permute.xlu1 %v1968_v15 }
  0x49   : > { %840 = vperm.xlu1 %1884, %v2061_v6  }
  0x4a   : > { %1926 = vset.pattern.permute.xlu0 %v1974_v21 }
  0x4b   : > { %1301 = vperm.xlu0 %1926, %v2080_v10  }
  0x4d   : > { %1885 = vset.pattern.permute.xlu1 %v1970_v18 }
  0x4e   : > { %941 = vperm.xlu1 %1885, %v2048_v1  }
  0x4f   : > { %1928 = vrot.lane.b32.xlu0 %v2897_v5, %s1975_s17 }
  0x52   : > { %1887 = vrot.lane.b32.xlu1 %v2897_v5, %s1976_s18 }
  0x53   : > { %1891 = vset.pattern.permute.xlu1 %v1969_v17  ;;  %1305 = vperm.xlu0 %1926, %v2092_v13  }
  0x56   : > { %917 = vperm.xlu1 %1891, %v2092_v13  }
  0x57   : > { %1937 = vset.pattern.permute.xlu0 %v1964_v2 }
  0x58   : > { %345 = vperm.xlu0 %1937, %v339_v22  }
  0x5a   : > { %1893 = vset.pattern.permute.xlu1 %v1972_v19 }
  0x5b   : > { %1046 = vperm.xlu1 %1893, %v2048_v1  }
  0x5c   : > { %350 = vperm.xlu0 %1937, %v340_v23  }
  0x5f   : > { %1050 = vperm.xlu1 %1893, %v2080_v10  }
  0x60   : > { %645 = vperm.xlu0 %1937, %v2048_v1  }
  0x63   : > { %1900 = vrot.lane.b32.xlu1 %v2897_v5, %s1977_s25 }
  0x64   : > { %1904 = vset.pattern.permute.xlu1 %v1970_v18 }
  0x67   : > { %953 = vperm.xlu1 %1904, %v2061_v6  }
  0x6b   : > { %1905 = vset.pattern.permute.xlu1 %v1973_v20 }
  0x6c   : > { %1127 = vperm.xlu1 %1905, %v2048_v1  }
  0x70   : > { %1907 = vrot.lane.b32.xlu1 %v2897_v5, %s1976_s18 }
  0x71   : > { %1911 = vset.pattern.permute.xlu1 %v1972_v19 }
  0x74   : > { %1054 = vperm.xlu1 %1911, %v2092_v13  }
  0x78   : > { %1915 = vrot.lane.b32.xlu1 %v2897_v5, %s1977_s25 }
  0x79   : > { %1924 = vset.pattern.permute.xlu1 %v1973_v20 }
  0x7c   : > { %1920 = vrot.lane.b32.xlu1 %v2897_v5, %s1978_s26 }
  0x80   : > { %1139 = vperm.xlu1 %1924, %v2061_v6  }
  0x84   : > { %1925 = vset.pattern.permute.xlu1 %v1974_v21 }
  0x85   : > { %1297 = vperm.xlu1 %1925, %v2048_v1  }
  0x89   : > { %1933 = vrot.lane.b32.xlu1 %v2897_v5, %s1978_s26 }
  0x8d   : > { %1309 = vperm.xlu1 %1925, %v2061_v6  }
  0x8e   : > { %v2165_v24 = vpop.permute.xlu1 %355  ;;  %v2167_v25 = vpop.permute.xlu0 %680 }
  0x8f   : > { %v695_v26 = vmul.f32 0.0, %v2167_v25 }
  0x91   : > { %719 = vrot.lane.b32.xlu1 %v695_v26, %s1979_s27 }
  0x92   : > { %v2171_v27 = vpop.permute.xlu1 %360  ;;  %1938 = vset.pattern.permute.xlu1 %v1964_v2  ;;  %v2174_v28 = vpop.permute.xlu0 %692 }
  0x93   : > { %v704_v32 = vmul.f32 0.0, %v2174_v28 }
  0x97   : > { %v2176_v29 = vpop.permute.xlu1 %684 }
  0x98   : > { %v698_v30 = vmul.f32 0.0, %v2176_v29  ;;  %v2179_v31 = vpop.permute.xlu0 %1163 }
  0x9a   : > { %725 = vrot.lane.b32.xlu0 %v698_v30, %s1979_s27 }
  0x9b   : > { %v2183_v33 = vpop.permute.xlu1 %688 }
  0x9c   : > { %v701_v34 = vmul.f32 0.0, %v2183_v33 }
  0x9d   : > { %v2191_v36 = vpop.permute.xlu0 %832 }
  0x9e   : > { %737 = vrot.lane.b32.xlu0 %v704_v32, %s1979_s27  ;;  %731 = vrot.lane.b32.xlu1 %v701_v34, %s1979_s27 }
  0xa0   : > { %v2208_v42 = vpop.permute.xlu1 %1159 }
  0xa1   : > { %v2196_v38 = vpop.permute.xlu0 %836 }
  0xa2   : > { %1334 = vperm.xlu0 %1937, %v1328_v35   ;;  %1339 = vperm.xlu1 %1938, %v1329_v37  }
  0xa4   : > { %v2212_v44 = vpop.permute.xlu1 %1167 }
  0xa6   : > { %1940 = vrot.lane.b32.xlu1 %v2897_v5, %s1975_s17  ;;  %1945 = vrot.lane.b32.xlu0 %v2897_v5, %s1980_s13  ;;  %v2202_v39 = vpop.permute.xlu0 %909 }
  0xa8   : > { %v2216_v46 = vpop.permute.xlu1 %1171 }
  0xaa   : > { %v2204_v40 = vpop.permute.xlu0 %921 }
  0xab   : > { %2915 = vst [vmem:[#allocation3_spill] sm:$0xff] %v2204_v40 }
  0xad   : > { %v2220_v48 = vpop.permute.xlu1 %650 }
  0xaf   : > { %v2206_v41 = vpop.permute.xlu0 %945 }
  0xb2   : > { %v2224_v50 = vpop.permute.xlu1 %828 }
  0xb3   : > { %v2210_v43 = vpop.permute.xlu0 %1895 }
  0xb7   : > { %v2214_v45 = vpop.permute.xlu0 %949  ;;  %v2228_v52 = vpop.permute.xlu1 %655 }
  0xbb   : > { %v2232_v54 = vpop.permute.xlu1 %660 }
  0xbc   : > { %v2218_v47 = vpop.permute.xlu0 %1058  ;;  %2919 = vst [vmem:[#allocation7_spill] sm:$0xff] %v2232_v54 }
  0xbd   : > { %2916 = vst [vmem:[#allocation4_spill] sm:$0xff] %v2218_v47 }
  0xc0   : > { %v2236_v56 = vpop.permute.xlu1 %913 }
  0xc1   : > { %v2222_v49 = vpop.permute.xlu0 %1131 }
  0xc4   : > { %v2240_v58 = vpop.permute.xlu1 %1879 }
  0xc5   : > { %v2226_v51 = vpop.permute.xlu0 %1135 }
  0xc6   : > { %2917 = vst [vmem:[#allocation5_spill] sm:$0xff] %v2226_v51 }
  0xc8   : > { %v2242_v2 = vpop.permute.xlu1 %840 }
  0xc9   : > { %2921 = vst [vmem:[#allocation9_spill] sm:$0xff] %v2242_v2 }
  0xca   : > { %v2230_v53 = vpop.permute.xlu0 %1301 }
  0xcb   : > { %2918 = vst [vmem:[#allocation6_spill] sm:$0xff] %v2230_v53 }
  0xcd   : > { %v2244_v11 = vpop.permute.xlu1 %941 }
  0xce   : > { %v2234_v55 = vpop.permute.xlu0 %1928 }
  0xd1   : > { %v2256_v17 = vpop.permute.xlu1 %1887 }
  0xd2   : > { %v2238_v57 = vpop.permute.xlu0 %1305  ;;  %v1889_v2 = vunpack.i.l.bf16 %v2256_v17 }
  0xd3   : > { %2920 = vst [vmem:[#allocation8_spill] sm:$0xff] %v2238_v57 }
  0xd5   : > { %v2266_v21 = vpop.permute.xlu1 %917 }
  0xd7   : > { %v346_v59 = vpop.permute.xlu0 %345 }
  0xda   : > { %v2274_v30 = vpop.permute.xlu1 %1046 }
  0xdb   : > { %v351_v18 = vpop.permute.xlu0 %350 }
  0xde   : > { %v2285_v37 = vpop.permute.xlu1 %1050 }
  0xe9   : > { %v442_v60 = vpop.f32.mrb[0].mxu0 }
  0xea   : > { %v443_v61 = vadd.f32 %v442_v60, %v346_v59  ;;  %v444_v62 = vpop.f32.mrb[1].mxu0 }
  0xeb   : > { %v445_v0 = vadd.f32 %v444_v62, %v346_v59 }
  0xec   : > { %v465_v63 = vadd.f32 3.0, %v443_v61 }
  0xed   : > { %v448_v1 = vpop.f32.mrb[2].mxu0  ;;  %v466_v7 = vadd.f32 3.0, %v445_v0 }
  0xee   : > { %v473_v3 = vmax.f32 %v465_v63, 0.0  ;;  %v450_v4 = vpop.f32.mrb[3].mxu0  ;;  %v449_v20 = vadd.f32 %v448_v1, %v351_v18  ;;  %v2296_v1 = vpop.permute.xlu1 %1900 }
  0xef   : > { %v474_v13 = vmax.f32 %v466_v7, 0.0  ;;  %v451_v34 = vadd.f32 %v450_v4, %v351_v18 }
  0xf0   : > { %v481_v6 = vmin.f32 %v473_v3, 6.0  ;;  %v467_v23 = vadd.f32 3.0, %v449_v20 }
  0xf1   : > { %v454_v8 = vpop.f32.mrb[4].mxu0  ;;  %v482_v16 = vmin.f32 %v474_v13, 6.0  ;;  %v468_v60 = vadd.f32 3.0, %v451_v34 }
  0xf2   : > { %v489_v9 = vmul.f32 0.16666667, %v481_v6  ;;  %v456_v10 = vpop.f32.mrb[5].mxu0  ;;  %v475_v26 = vmax.f32 %v467_v23, 0.0  ;;  %v2306_v6 = vpop.permute.xlu1 %953  ;;  %v455_v18 = vadd.f32 %v454_v8, %v2165_v24 }
  0xf3   : > { %v490_v19 = vmul.f32 0.16666667, %v482_v16  ;;  %v476_v63 = vmax.f32 %v468_v60, 0.0  ;;  %2922 = vst [vmem:[#allocation10_spill] sm:$0xff] %v2306_v6 }
  0xf4   : > { %v2246_v12 = vmul.f32 %v489_v9, %v443_v61  ;;  %v483_v32 = vmin.f32 %v475_v26, 6.0  ;;  %v457_v9 = vadd.f32 %v456_v10, %v2165_v24 }
  0xf5   : > { %v2248_v14 = vpop.f32.mrb[6].mxu0  ;;  %v2268_v22 = vmul.f32 %v490_v19, %v445_v0  ;;  %v484_v3 = vmin.f32 %v476_v63, 6.0  ;;  %v469_v19 = vadd.f32 3.0, %v455_v18 }
  0xf6   : > { %v2250_v15 = vpop.f32.mrb[7].mxu0  ;;  %780 = vrot.lane.b32.xlu1 %v2246_v12, %s1976_s18  ;;  %596 = vrot.lane.b32.xlu0 %v2246_v12, %s1971_s16  ;;  %v696_v35 = vmul.f32 %v2167_v25, %v2246_v12  ;;  %v491_v59 = vmul.f32 0.16666667, %v483_v32  ;;  %v1174_v0 = vmul.f32 %v2208_v42, %v2246_v12  ;;  %v470_v16 = vadd.f32 3.0, %v457_v9 }
  0xf7   : > { %v1175_v61 = vmul.f32 %v2208_v42, %v2268_v22  ;;  %v697_v4 = vmul.f32 %v2167_v25, %v2268_v22  ;;  %v492_v7 = vmul.f32 0.16666667, %v484_v3  ;;  %v2315_v25 = vpop.permute.xlu1 %1127  ;;  %v477_v26 = vmax.f32 %v469_v19, 0.0 }
  0xf8   : > { %v2292_v62 = vmul.f32 %v491_v59, %v449_v20  ;;  %v478_v10 = vmax.f32 %v470_v16, 0.0  ;;  %v461_v60 = vadd.f32 %v2248_v14, %v2171_v27 }
  0xf9   : > { %v2313_v13 = vmul.f32 %v492_v7, %v451_v34  ;;  %v485_v34 = vmin.f32 %v477_v26, 6.0 }
  0xfa   : > { %996 = vrot.lane.b32.xlu1 %v2246_v12, %s1978_s26  ;;  %861 = vrot.lane.b32.xlu0 %v2246_v12, %s1977_s25  ;;  %v486_v20 = vmin.f32 %v478_v10, 6.0  ;;  %v699_v63 = vmul.f32 %v2176_v29, %v2292_v62  ;;  %v471_v3 = vadd.f32 3.0, %v461_v60 }
  0xfb   : > { %v2326_v23 = vpop.permute.xlu1 %1907  ;;  %v700_v24 = vmul.f32 %v2176_v29, %v2313_v13  ;;  %v493_v59 = vmul.f32 0.16666667, %v485_v34  ;;  %v463_v29 = vadd.f32 %v2250_v15, %v2171_v27 }
  0xfc   : > { %v494_v32 = vmul.f32 0.16666667, %v486_v20  ;;  %v479_v14 = vmax.f32 %v471_v3, 0.0 }
  0xfe   : > { %1077 = vrot.lane.b32.xlu1 %v2246_v12, %s1975_s17  ;;  %1247 = vrot.lane.b32.xlu0 %v2246_v12, %s1980_s13  ;;  %v487_v7 = vmin.f32 %v479_v14, 6.0 }
  0xff   : > { %v2334_v8 = vpop.permute.xlu1 %1054 }
 0x102   : > { %598 = vrot.lane.b32.xlu1 %v2268_v22, %s1971_s16  ;;  %782 = vrot.lane.b32.xlu0 %v2268_v22, %s1976_s18 }
 0x106   : > { %863 = vrot.lane.b32.xlu1 %v2268_v22, %s1977_s25  ;;  %998 = vrot.lane.b32.xlu0 %v2268_v22, %s1978_s26 }
 0x10a   : > { %1079 = vrot.lane.b32.xlu1 %v2268_v22, %s1975_s17  ;;  %721 = vrot.lane.b32.xlu0 %v696_v35, %s1979_s27  ;;  %v2339_v35 = vmul.f32 %v494_v32, %v457_v9  ;;  %v472_v9 = vadd.f32 3.0, %v463_v29 }
 0x10c   : > { %2923 = vst [vmem:[#allocation11_spill] sm:$0xff] %v2339_v35  ;;  %v480_v10 = vmax.f32 %v472_v9, 0.0 }
 0x10e   : > { %1249 = vrot.lane.b32.xlu1 %v2268_v22, %s1980_s13  ;;  %1200 = vrot.lane.b32.xlu0 %v1175_v61, %s1981_s14  ;;  %v2347_v61 = vpop.permute.xlu1 %1915  ;;  %v488_v20 = vmin.f32 %v480_v10, 6.0  ;;  %v1179_v10 = vmul.f32 0.0, %v2179_v31 }
 0x110   : > { %v496_v26 = vmul.f32 0.16666667, %v488_v20 }
 0x112   : > { %1198 = vrot.lane.b32.xlu1 %v1174_v0, %s1981_s14  ;;  %602 = vrot.lane.b32.xlu0 %v2292_v62, %s1971_s16  ;;  %v2354_v0 = vmul.f32 %v493_v59, %v455_v18  ;;  %v495_v18 = vmul.f32 0.16666667, %v487_v7  ;;  %v2394_v34 = vmul.f32 %v496_v26, %v463_v29  ;;  %v1177_v7 = vmul.f32 %v2179_v31, %v2292_v62 }
 0x114   : > { %v702_v27 = vmul.f32 %v2183_v33, %v2354_v0  ;;  %v2381_v19 = vmul.f32 %v495_v18, %v461_v60  ;;  %2925 = vst [vmem:[#allocation13_spill] sm:$0xff] %v2394_v34  ;;  %v2402_v60 = vpop.permute.xlu0 %645  ;;  %v706_v14 = vmul.f32 %v2174_v28, %v2394_v34 }
 0x116   : > { %723 = vrot.lane.b32.xlu1 %v697_v4, %s1979_s27  ;;  %867 = vrot.lane.b32.xlu0 %v2292_v62, %s1977_s25  ;;  %v2356_v4 = vpop.permute.xlu1 %1920 }
 0x11a   : > { %786 = vrot.lane.b32.xlu1 %v2292_v62, %s1976_s18  ;;  %1002 = vrot.lane.b32.xlu0 %v2292_v62, %s1978_s26  ;;  %v2368_v16 = vpop.permute.xlu1 %1139 }
 0x11b   : > { %2924 = vst [vmem:[#allocation12_spill] sm:$0xff] %v2368_v16  ;;  %v1182_v16 = vmul.f32 0.0, %v2212_v44 }
 0x11e   : > { %1083 = vrot.lane.b32.xlu1 %v2292_v62, %s1975_s17  ;;  %788 = vrot.lane.b32.xlu0 %v2313_v13, %s1976_s18  ;;  %v2376_v15 = vpop.permute.xlu1 %1297 }
 0x122   : > { %1253 = vrot.lane.b32.xlu1 %v2292_v62, %s1980_s13  ;;  %1085 = vrot.lane.b32.xlu0 %v2313_v13, %s1975_s17  ;;  %v2387_v32 = vpop.permute.xlu1 %1933 }
 0x126   : > { %604 = vrot.lane.b32.xlu1 %v2313_v13, %s1971_s16  ;;  %1255 = vrot.lane.b32.xlu0 %v2313_v13, %s1980_s13  ;;  %v2396_v59 = vpop.permute.xlu1 %1309 }
 0x127   : > { %2926 = vst [vmem:[#allocation14_spill] sm:$0xff] %v2396_v59 }
 0x12a   : > { %869 = vrot.lane.b32.xlu1 %v2313_v13, %s1977_s25  ;;  %729 = vrot.lane.b32.xlu0 %v700_v24, %s1979_s27  ;;  %v703_v24 = vmul.f32 %v2183_v33, %v2339_v35  ;;  %v2408_v33 = vpop.permute.xlu0 %725 }
 0x12e   : > { %1004 = vrot.lane.b32.xlu1 %v2313_v13, %s1978_s26  ;;  %610 = vrot.lane.b32.xlu0 %v2339_v35, %s1971_s16  ;;  %v2420_v29 = vpop.permute.xlu0 %737 }
 0x12f   : > { %2927 = vst [vmem:[#allocation15_spill] sm:$0xff] %v2420_v29  ;;  %v2934_v29 = vmov 0.0  }
 0x132   : > { %727 = vrot.lane.b32.xlu1 %v699_v63, %s1979_s27  ;;  %794 = vrot.lane.b32.xlu0 %v2339_v35, %s1976_s18  ;;  %v2410_v63 = vpop.permute.xlu1 %719  ;;  %v2429_v18 = vpop.permute.xlu0 %1334 }
 0x133   : > { %2929 = vst [vmem:[#allocation17_spill] sm:$0xff] %v2429_v18 }
 0x136   : > { %608 = vrot.lane.b32.xlu1 %v2354_v0, %s1971_s16  ;;  %875 = vrot.lane.b32.xlu0 %v2339_v35, %s1977_s25  ;;  %v2416_v3 = vpop.permute.xlu1 %731  ;;  %v2441_v26 = vpop.permute.xlu0 %1945 }
 0x137   : > { %2931 = vst [vmem:[#allocation19_spill] sm:$0xff] %v2441_v26 }
 0x13a   : > { %792 = vrot.lane.b32.xlu1 %v2354_v0, %s1976_s18  ;;  %1010 = vrot.lane.b32.xlu0 %v2339_v35, %s1978_s26  ;;  %v2427_v9 = vpop.permute.xlu1 %1339 }
 0x13b   : > { %2928 = vst [vmem:[#allocation16_spill] sm:$0xff] %v2427_v9 }
 0x13e   : > { %873 = vrot.lane.b32.xlu1 %v2354_v0, %s1977_s25  ;;  %1091 = vrot.lane.b32.xlu0 %v2339_v35, %s1975_s17  ;;  %v2439_v20 = vpop.permute.xlu1 %1940 }
 0x13f   : > { %2930 = vst [vmem:[#allocation18_spill] sm:$0xff] %v2439_v20 }
 0x142   : > { %1008 = vrot.lane.b32.xlu1 %v2354_v0, %s1978_s26  ;;  %733 = vrot.lane.b32.xlu0 %v702_v27, %s1979_s27  ;;  %v705_v27 = vmul.f32 %v2174_v28, %v2381_v19  ;;  %v1178_v28 = vmul.f32 %v2179_v31, %v2313_v13  ;;  %v1180_v31 = vmul.f32 %v2212_v44, %v2354_v0 }
 0x146   : > { %1089 = vrot.lane.b32.xlu1 %v2354_v0, %s1975_s17  ;;  %1014 = vrot.lane.b32.xlu0 %v2381_v19, %s1978_s26 }
 0x14a   : > { %735 = vrot.lane.b32.xlu1 %v703_v24, %s1979_s27  ;;  %1095 = vrot.lane.b32.xlu0 %v2381_v19, %s1975_s17  ;;  %v1331_v24 = vld [vmem:[%s2891_s4 + $0x18] sm:$0xff] }
 0x14e   : > { %614 = vrot.lane.b32.xlu1 %v2381_v19, %s1971_s16  ;;  %616 = vrot.lane.b32.xlu0 %v2394_v34, %s1971_s16 }
 0x152   : > { %798 = vrot.lane.b32.xlu1 %v2381_v19, %s1976_s18  ;;  %800 = vrot.lane.b32.xlu0 %v2394_v34, %s1976_s18  ;;  %s332_s18 = scalar_lea.vmem %s2896_s9, %s1795_s19 }
 0x156   : > { %879 = vrot.lane.b32.xlu1 %v2381_v19, %s1977_s25  ;;  %881 = vrot.lane.b32.xlu0 %v2394_v34, %s1977_s25 }
 0x15a   : > { %1016 = vrot.lane.b32.xlu1 %v2394_v34, %s1978_s26  ;;  %741 = vrot.lane.b32.xlu0 %v706_v14, %s1979_s27  ;;  %v1176_v14 = vmul.f32 0.0, %v2208_v42 }
 0x15e   : > { %1097 = vrot.lane.b32.xlu1 %v2394_v34, %s1975_s17  ;;  %1204 = vrot.lane.b32.xlu0 %v1177_v7, %s1981_s14 }
 0x162   : > { %739 = vrot.lane.b32.xlu1 %v705_v27, %s1979_s27  ;;  %1208 = vrot.lane.b32.xlu0 %v1179_v10, %s1981_s14  ;;  %v529_v27 = vlaneseq  ;;  %v1330_v10 = vld [vmem:[%s2891_s4 + $0x10] sm:$0xff] }
 0x164   : > { %v530_v57 = vand.u32 127, %v529_v27  ;;  %v1881_v27 = vunpack.i.l.bf16 %v2240_v58 }
 0x166   : > { %1202 = vrot.lane.b32.xlu1 %v1176_v14, %s1981_s14  ;;  %1349 = vperm.xlu0 %1937, %v1331_v24  }
 0x168   : > { %v781_v7 = vpop.permute.xlu1 %780  ;;  %v597_v5 = vpop.permute.xlu0 %596 }
 0x169   : > { %v803_v9 = vsel %vm802_vm2, %v1889_v2, %v781_v7  ;;  %v1930_v2 = vunpack.i.l.bf16 %v2234_v55 }
 0x16a   : > { %1206 = vrot.lane.b32.xlu1 %v1178_v28, %s1981_s14  ;;  %1261 = vrot.lane.b32.xlu0 %v2339_v35, %s1980_s13  ;;  %v536_v28 = vand.u32 15, %v530_v57 }
 0x16c   : > { %v997_v59 = vpop.permute.xlu1 %996  ;;  %v862_v42 = vpop.permute.xlu0 %861  ;;  %vm2472_vm3 = vcmp.ge.s32.totalorder %v536_v28, 1  ;;  %vm2481_vm6 = vcmp.le.s32.totalorder %v536_v28, 14  ;;  %v531_v28 = vadd.s32 128, %v530_v57 }
 0x16e   : > { %1344 = vperm.xlu1 %1938, %v1330_v10   ;;  %1265 = vrot.lane.b32.xlu0 %v2381_v19, %s1980_s13 }
 0x170   : > { %v1078_v24 = vpop.permute.xlu1 %1077  ;;  %v1248_v14 = vpop.permute.xlu0 %1247 }
 0x172   : > { %1259 = vrot.lane.b32.xlu1 %v2354_v0, %s1980_s13  ;;  %1210 = vrot.lane.b32.xlu0 %v1180_v31, %s1981_s14  ;;  %v619_v31 = vsel %vm618_vm1, %v1881_v27, %v597_v5 }
 0x173   : > { %v635_v27 = vsel %vm2472_vm3, %v619_v31, 0.0 }
 0x174   : > { %v599_v10 = vpop.permute.xlu1 %598  ;;  %v783_v47 = vpop.permute.xlu0 %782  ;;  %v663_v31 = vmul.f32 %v2402_v60, %v635_v27 }
 0x175   : > { %v2466_v6 = vsel %vm618_vm1, %v597_v5, %v599_v10  ;;  %v2469_v40 = vsel %vm802_vm2, %v781_v7, %v783_v47  ;;  %v1902_v10 = vunpack.i.l.bf16 %v2296_v1  ;;  %v1184_v5 = vmul.f32 %v2216_v46, %v2394_v34 }
 0x176   : > { %1950 = vrot.lane.b32.xlu1 %v2934_v29, %s1980_s13  ;;  %1214 = vrot.lane.b32.xlu0 %v1182_v16, %s1981_s14  ;;  %v819_v7 = vsel %vm2481_vm6, %v803_v9, 0.0  ;;  %v543_v9 = vand.u32 15, %v531_v28 }
 0x177   : > { %v884_v26 = vsel %vm883_vm5, %v1902_v10, %v862_v42 }
 0x178   : > { %v864_v18 = vpop.permute.xlu1 %863  ;;  %v999_v53 = vpop.permute.xlu0 %998  ;;  %v900_v57 = vsel %vm2472_vm3, %v884_v26, 0.0  ;;  %vm2521_vm10 = vcmp.ge.s32.totalorder %v543_v9, 1  ;;  %vm2528_vm11 = vcmp.le.s32.totalorder %v543_v9, 14 }
 0x179   : > { %v885_v16 = vsel %vm883_vm5, %v862_v42, %v864_v18  ;;  %v1021_v29 = vsel %vm1020_vm4, %v997_v59, %v999_v53  ;;  %v1181_v59 = vmul.f32 %v2212_v44, %v2339_v35  ;;  %v924_v27 = vmul.f32 %v2202_v39, %v900_v57 }
 0x17a   : > { %1267 = vrot.lane.b32.xlu1 %v2394_v34, %s1980_s13  ;;  %1218 = vrot.lane.b32.xlu0 %v1184_v5, %s1981_s14  ;;  %v843_v34 = vmul.f32 %v2224_v50, %v819_v7 }
 0x17c   : > { %v1080_v18 = vpop.permute.xlu1 %1079  ;;  %v722_v51 = vpop.permute.xlu0 %721 }
 0x17d   : > { %v1102_v42 = vsel %vm1101_vm7, %v1078_v24, %v1080_v18  ;;  %v1103_v10 = vsel %vm1101_vm7, %v1080_v18, %v1930_v2  ;;  %v744_v5 = vsel %vm743_vm8, %v2410_v63, %v722_v51  ;;  %v1183_v24 = vmul.f32 %v2216_v46, %v2381_v19 }
 0x17e   : > { %v760_v20 = vadd.f32 %v744_v5, %v663_v31  ;;  %1212 = vrot.lane.b32.xlu1 %v1181_v59, %s1981_s14  ;;  %v1037_v63 = vsel %vm2481_vm6, %v1021_v29, 0.0  ;;  %v1118_v29 = vsel %vm2472_vm3, %v1102_v42, 0.0  ;;  %v1185_v31 = vmul.f32 0.0, %v2216_v46 }
 0x17f   : > { %v636_v5 = vsel %vm2521_vm10, %v2466_v6, 0.0  ;;  %v1142_v9 = vmul.f32 %v2315_v25, %v1118_v29  ;;  %v1922_v42 = vunpack.i.l.bf16 %v2356_v4 }
 0x180   : > { %v851_v44 = vadd.f32 %v843_v34, %v760_v20  ;;  %v2511_v35 = vpop.permute.xlu1 %1249  ;;  %v2513_v26 = vpop.permute.xlu0 %1200  ;;  %v956_v34 = vmul.f32 %v2244_v11, %v2246_v12  ;;  %v820_v12 = vsel %vm2528_vm11, %v2469_v40, 0.0  ;;  %v901_v40 = vsel %vm2521_vm10, %v885_v16, 0.0 }
 0x181   : > { %v1272_v28 = vsel %vm1271_vm9, %v1248_v14, %v2511_v35  ;;  %v1061_v14 = vmul.f32 %v2274_v30, %v1037_v63 }
 0x182   : > { %v932_v7 = vadd.f32 %v924_v27, %v851_v44  ;;  %1216 = vrot.lane.b32.xlu1 %v1183_v24, %s1981_s14  ;;  %v1288_v46 = vsel %vm2481_vm6, %v1272_v28, 0.0  ;;  %v664_v44 = vmul.f32 %v2402_v60, %v636_v5  ;;  %v925_v60 = vmul.f32 %v2202_v39, %v901_v40 }
 0x183   : > { %v1312_v28 = vmul.f32 %v2376_v15, %v1288_v46 }
 0x184   : > { %v1199_v18 = vpop.permute.xlu1 %1198  ;;  %v964_v59 = vadd.f32 %v956_v34, %v932_v7  ;;  %v603_v57 = vpop.permute.xlu0 %602  ;;  %v844_v7 = vmul.f32 %v2224_v50, %v820_v12 }
 0x185   : > { %v1223_v34 = vsel %vm1222_vm12, %v1199_v18, %v2513_v26 }
 0x186   : > { %v1069_v27 = vadd.f32 %v1061_v14, %v964_v59  ;;  %1220 = vrot.lane.b32.xlu1 %v1185_v31, %s1981_s14  ;;  %v1022_v31 = vsel %vm1020_vm4, %v999_v53, %v1922_v42  ;;  %v1119_v53 = vsel %vm2521_vm10, %v1103_v10, 0.0 }
 0x187   : > { %v1038_v16 = vsel %vm2528_vm11, %v1022_v31, 0.0 }
 0x188   : > { %v1150_v24 = vadd.f32 %v1142_v9, %v1069_v27  ;;  %v724_v63 = vpop.permute.xlu1 %723  ;;  %v868_v6 = vpop.permute.xlu0 %867  ;;  %v1062_v18 = vmul.f32 %v2274_v30, %v1038_v16  ;;  %v1890_v30 = vunpack.i.h.bf16 %v2256_v17 }
 0x189   : > { %v745_v29 = vsel %vm743_vm8, %v722_v51, %v724_v63  ;;  %v957_v51 = vmul.f32 %v2244_v11, %v2268_v22  ;;  %v1882_v11 = vunpack.i.h.bf16 %v2240_v58 }
 0x18a   : > { %v1239_v14 = vadd.f32 %v1223_v34, %v1150_v24  ;;  %v761_v59 = vadd.f32 %v745_v29, %v664_v44  ;;  %v1143_v44 = vmul.f32 %v2315_v25, %v1119_v53  ;;  %v1903_v25 = vunpack.i.h.bf16 %v2296_v1 }
 0x18b   : > { %v621_v31 = vsel %vm618_vm1, %v1882_v11, %v603_v57 }
 0x18c   : > { %v2557_v5 = vadd.f32 %v1312_v28, %v1239_v14  ;;  %v852_v9 = vadd.f32 %v844_v7, %v761_v59  ;;  %v787_v50 = vpop.permute.xlu1 %786  ;;  %v1003_v12 = vpop.permute.xlu0 %1002  ;;  %v637_v16 = vsel %vm2472_vm3, %v621_v31, 0.0  ;;  %v886_v58 = vsel %vm883_vm5, %v1903_v25, %v868_v6 }
 0x18d   : > { %v805_v14 = vsel %vm802_vm2, %v1890_v30, %v787_v50  ;;  %v902_v53 = vsel %vm2472_vm3, %v886_v58, 0.0 }
 0x18e   : > { %v933_v27 = vadd.f32 %v925_v60, %v852_v9  ;;  %v926_v31 = vmul.f32 %v2236_v56, %v902_v53 }
 0x190   : > { %v1084_v46 = vpop.permute.xlu1 %1083  ;;  %v789_v42 = vpop.permute.xlu0 %788  ;;  %v965_v39 = vadd.f32 %v957_v51, %v933_v27  ;;  %v821_v27 = vsel %vm2481_vm6, %v805_v14, 0.0  ;;  %v665_v51 = vmul.f32 %v2220_v48, %v637_v16 }
 0x191   : > { %v806_v59 = vsel %vm802_vm2, %v787_v50, %v789_v42  ;;  %v1923_v50 = vunpack.i.h.bf16 %v2356_v4 }
 0x192   : > { %v1070_v24 = vadd.f32 %v1062_v18, %v965_v39  ;;  %v822_v1 = vsel %vm2528_vm11, %v806_v59, 0.0 }
 0x193   : > { %v846_v4 = vmul.f32 %v2191_v36, %v822_v1 }
 0x194   : > { %v2567_v63 = vpop.permute.xlu1 %1253  ;;  %v1086_v7 = vpop.permute.xlu0 %1085  ;;  %v2569_v40 = vadd.f32 %v1143_v44, %v1070_v24  ;;  %v845_v44 = vmul.f32 %v2191_v36, %v821_v27  ;;  %v1897_v27 = vunpack.i.l.bf16 %v2210_v43 }
 0x195   : > { %v1104_v25 = vsel %vm1101_vm7, %v1084_v46, %v1086_v7 }
 0x198   : > { %v605_v34 = vpop.permute.xlu1 %604  ;;  %v2571_v29 = vpop.permute.xlu0 %1255 }
 0x199   : > { %v622_v28 = vsel %vm618_vm1, %v603_v57, %v605_v34 }
 0x19a   : > { %v638_v17 = vsel %vm2521_vm10, %v622_v28, 0.0 }
 0x19b   : > { %v666_v18 = vmul.f32 %v2220_v48, %v638_v17  ;;  %v1931_v48 = vunpack.i.h.bf16 %v2234_v55  ;;  %v958_v55 = vmul.f32 %v2206_v41, %v2292_v62 }
 0x19c   : > { %v870_v22 = vpop.permute.xlu1 %869  ;;  %v730_v10 = vpop.permute.xlu0 %729 }
 0x19d   : > { %v887_v57 = vsel %vm883_vm5, %v868_v6, %v870_v22  ;;  %v1105_v36 = vsel %vm1101_vm7, %v1086_v7, %v1931_v48  ;;  %v1935_v7 = vunpack.i.l.bf16 %v2387_v32 }
 0x19e   : > { %v903_v24 = vsel %vm2521_vm10, %v887_v57, 0.0  ;;  %v1120_v57 = vsel %vm2472_vm3, %v1104_v25, 0.0 }
 0x19f   : > { %v927_v14 = vmul.f32 %v2236_v56, %v903_v24  ;;  %v959_v56 = vmul.f32 %v2206_v41, %v2313_v13 }
 0x1a0   : > { %v1005_v60 = vpop.permute.xlu1 %1004  ;;  %v611_v9 = vpop.permute.xlu0 %610 }
 0x1a1   : > { %v1023_v11 = vsel %vm1020_vm4, %v1003_v12, %v1005_v60  ;;  %v1024_v28 = vsel %vm1020_vm4, %v1005_v60, %v1923_v50 }
 0x1a2   : > { %v1039_v12 = vsel %vm2481_vm6, %v1023_v11, 0.0  ;;  %v1040_v60 = vsel %vm2528_vm11, %v1024_v28, 0.0  ;;  %v1917_v11 = vunpack.i.l.bf16 %v2347_v61 }
 0x1a3   : > { %v1063_v62 = vmul.f32 %v2285_v37, %v1039_v12 }
 0x1a4   : > { %v728_v42 = vpop.permute.xlu1 %727  ;;  %v795_v39 = vpop.permute.xlu0 %794 }
 0x1a5   : > { %v746_v6 = vsel %vm743_vm8, %v2408_v33, %v728_v42  ;;  %v747_v34 = vsel %vm743_vm8, %v728_v42, %v730_v10  ;;  %v1909_v42 = vunpack.i.l.bf16 %v2326_v23 }
 0x1a6   : > { %v762_v22 = vadd.f32 %v746_v6, %v665_v51  ;;  %v763_v30 = vadd.f32 %v747_v34, %v666_v18  ;;  %v1064_v18 = vmul.f32 %v2285_v37, %v1040_v60 }
 0x1a8   : > { %v853_v59 = vadd.f32 %v845_v44, %v762_v22  ;;  %v854_v33 = vadd.f32 %v846_v4, %v763_v30  ;;  %v609_v16 = vpop.permute.xlu1 %608  ;;  %v876_v10 = vpop.permute.xlu0 %875  ;;  %v1144_v44 = vmul.f32 %v2222_v49, %v1120_v57 }
 0x1a9   : > { %v624_v58 = vsel %vm618_vm1, %v609_v16, %v611_v9  ;;  %v1121_v9 = vsel %vm2521_vm10, %v1105_v36, 0.0  ;;  %v623_v24 = vsel %vm618_vm1, %v1897_v27, %v609_v16 }
 0x1aa   : > { %v934_v46 = vadd.f32 %v926_v31, %v853_v59  ;;  %v935_v17 = vadd.f32 %v927_v14, %v854_v33  ;;  %v1145_v34 = vmul.f32 %v2222_v49, %v1121_v9  ;;  %v640_v27 = vsel %vm2521_vm10, %v624_v58, 0.0 }
 0x1ac   : > { %v793_v1 = vpop.permute.xlu1 %792  ;;  %v1011_v50 = vpop.permute.xlu0 %1010  ;;  %v966_v51 = vadd.f32 %v958_v55, %v934_v46  ;;  %v967_v53 = vadd.f32 %v959_v56, %v935_v17 }
 0x1ad   : > { %v808_v41 = vsel %vm802_vm2, %v793_v1, %v795_v39  ;;  %v1026_v13 = vsel %vm1020_vm4, %v1011_v50, %v1935_v7  ;;  %v807_v22 = vsel %vm802_vm2, %v1909_v42, %v793_v1  ;;  %v639_v39 = vsel %vm2472_vm3, %v623_v24, 0.0  ;;  %v2941_v42 = vld [vmem:[#allocation18_spill] sm:$0xff] }
 0x1ae   : > { %v1071_v6 = vadd.f32 %v1063_v62, %v966_v51  ;;  %v1072_v4 = vadd.f32 %v1064_v18, %v967_v53  ;;  %v823_v49 = vsel %vm2481_vm6, %v807_v22, 0.0  ;;  %v667_v14 = vmul.f32 %v2228_v52, %v639_v39 }
 0x1af   : > { %v824_v62 = vsel %vm2528_vm11, %v808_v41, 0.0 }
 0x1b0   : > { %v874_v30 = vpop.permute.xlu1 %873  ;;  %v1092_v37 = vpop.permute.xlu0 %1091  ;;  %v2634_v48 = vadd.f32 %v1144_v44, %v1071_v6  ;;  %v2639_v28 = vadd.f32 %v1145_v34, %v1072_v4  ;;  %v1942_v44 = vunpack.i.l.bf16 %v2941_v42  ;;  %v848_v41 = vmul.f32 %v2196_v38, %v824_v62  ;;  %v2942_v6 = vld [vmem:[#allocation5_spill] sm:$0xff] }
 0x1b1   : > { %v889_v31 = vsel %vm883_vm5, %v874_v30, %v876_v10  ;;  %v888_v25 = vsel %vm883_vm5, %v1917_v11, %v874_v30  ;;  %v847_v10 = vmul.f32 %v2196_v38, %v823_v49 }
 0x1b2   : > { %v904_v16 = vsel %vm2472_vm3, %v888_v25, 0.0  ;;  %v905_v24 = vsel %vm2521_vm10, %v889_v31, 0.0  ;;  %v1107_v22 = vsel %vm1101_vm7, %v1092_v37, %v1942_v44  ;;  %v1042_v31 = vsel %vm2528_vm11, %v1026_v13, 0.0 }
 0x1b3   : > { %v928_v60 = vmul.f32 %v2266_v21, %v904_v16  ;;  %v1066_v16 = vmul.f32 %v2334_v8, %v1042_v31 }
 0x1b4   : > { %v1009_v59 = vpop.permute.xlu1 %1008  ;;  %v734_v33 = vpop.permute.xlu0 %733 }
 0x1b5   : > { %v1025_v36 = vsel %vm1020_vm4, %v1009_v59, %v1011_v50  ;;  %v748_v12 = vsel %vm743_vm8, %v2416_v3, %v734_v33  ;;  %v960_v3 = vmul.f32 %v2214_v45, %v2354_v0  ;;  %v668_v50 = vmul.f32 %v2228_v52, %v640_v27  ;;  %v2943_v59 = vld [vmem:[#allocation11_spill] sm:$0xff] }
 0x1b6   : > { %v764_v55 = vadd.f32 %v748_v12, %v667_v14  ;;  %v1041_v7 = vsel %vm2481_vm6, %v1025_v36, 0.0  ;;  %v929_v52 = vmul.f32 %v2266_v21, %v905_v24  ;;  %v961_v38 = vmul.f32 %v2214_v45, %v2943_v59  ;;  %v2944_v27 = vld [vmem:[#allocation19_spill] sm:$0xff]  ;;  %v2947_v59 = vld [vmem:[#allocation16_spill] sm:$0xff] }
 0x1b7   : > { %v1065_v51 = vmul.f32 %v2334_v8, %v1041_v7  ;;  %v1947_v7 = vunpack.i.l.bf16 %v2944_v27 }
 0x1b8   : > { %v855_v46 = vadd.f32 %v847_v10, %v764_v55  ;;  %v1090_v17 = vpop.permute.xlu1 %1089  ;;  %v2652_v56 = vpop.permute.xlu0 %1014 }
 0x1b9   : > { %v1106_v57 = vsel %vm1101_vm7, %v1090_v17, %v1092_v37  ;;  %v1273_v8 = vsel %vm1271_vm9, %v2511_v35, %v1947_v7 }
 0x1ba   : > { %v936_v9 = vadd.f32 %v928_v60, %v855_v46  ;;  %v1122_v1 = vsel %vm2472_vm3, %v1106_v57, 0.0  ;;  %v1289_v62 = vsel %vm2528_vm11, %v1273_v8, 0.0  ;;  %v2948_v8 = vld [vmem:[#allocation15_spill] sm:$0xff] }
 0x1bb   : > { %v1146_v34 = vmul.f32 %v2942_v6, %v1122_v1  ;;  %v1274_v1 = vsel %vm1271_vm9, %v2567_v63, %v2571_v29  ;;  %v1313_v35 = vmul.f32 %v2376_v15, %v1289_v62 }
 0x1bc   : > { %v736_v58 = vpop.permute.xlu1 %735  ;;  %v2667_v53 = vpop.permute.xlu0 %1095  ;;  %v968_v18 = vadd.f32 %v960_v3, %v936_v9  ;;  %v1948_v9 = vunpack.i.h.bf16 %v2944_v27 }
 0x1bd   : > { %v749_v0 = vsel %vm743_vm8, %v734_v33, %v736_v58  ;;  %v1123_v33 = vsel %vm2521_vm10, %v1107_v22, 0.0 }
 0x1be   : > { %v765_v4 = vadd.f32 %v749_v0, %v668_v50  ;;  %v1073_v11 = vadd.f32 %v1065_v51, %v968_v18  ;;  %v1147_v12 = vmul.f32 %v2942_v6, %v1123_v33  ;;  %v1275_v50 = vsel %vm1271_vm9, %v2571_v29, %v1948_v9  ;;  %v2945_v6 = vld [vmem:[#allocation6_spill] sm:$0xff] }
 0x1bf   : > { %v1290_v18 = vsel %vm2481_vm6, %v1274_v1, 0.0  ;;  %v1291_v24 = vsel %vm2528_vm11, %v1275_v50, 0.0  ;;  %v1898_v33 = vunpack.i.h.bf16 %v2210_v43  ;;  %v1918_v9 = vunpack.i.h.bf16 %v2347_v61 }
 0x1c0   : > { %v856_v30 = vadd.f32 %v848_v41, %v765_v4  ;;  %v615_v39 = vpop.permute.xlu1 %614  ;;  %v617_v25 = vpop.permute.xlu0 %616  ;;  %v2677_v49 = vadd.f32 %v1146_v34, %v1073_v11  ;;  %v1314_v34 = vmul.f32 %v2945_v6, %v1290_v18  ;;  %v1315_v11 = vmul.f32 %v2945_v6, %v1291_v24 }
 0x1c2   : > { %v937_v14 = vadd.f32 %v929_v52, %v856_v30 }
 0x1c4   : > { %v799_v21 = vpop.permute.xlu1 %798  ;;  %v801_v36 = vpop.permute.xlu0 %800  ;;  %v969_v37 = vadd.f32 %v961_v38, %v937_v14 }
 0x1c5   : > { %v810_v50 = vsel %vm802_vm2, %v799_v21, %v801_v36 }
 0x1c6   : > { %v1074_v10 = vadd.f32 %v1066_v16, %v969_v37  ;;  %v1910_v37 = vunpack.i.h.bf16 %v2326_v23 }
 0x1c8   : > { %v2687_v55 = vpop.permute.xlu1 %879  ;;  %v2689_v60 = vadd.f32 %v1147_v12, %v1074_v10  ;;  %v882_v13 = vpop.permute.xlu0 %881  ;;  %v626_v10 = vsel %vm618_vm1, %v615_v39, %v617_v25  ;;  %v809_v27 = vsel %vm802_vm2, %v1910_v37, %v799_v21 }
 0x1c9   : > { %v642_v1 = vsel %vm2521_vm10, %v626_v10, 0.0  ;;  %v825_v23 = vsel %vm2481_vm6, %v809_v27, 0.0  ;;  %v891_v21 = vsel %vm883_vm5, %v2687_v55, %v882_v13  ;;  %v1982_v13 = vmov 0.0|0.0  }
 0x1ca   : > { %1826 = vmatprep.subr.bf16.mxu1 %v1982_v13 }
 0x1cc   : > { %v2691_v46 = vpop.permute.xlu1 %1016  ;;  %v742_v17 = vpop.permute.xlu0 %741 }
 0x1d0   : > { %v2693_v45 = vpop.permute.xlu1 %1097  ;;  %v1205_v3 = vpop.permute.xlu0 %1204 }
 0x1d4   : > { %v740_v57 = vpop.permute.xlu1 %739  ;;  %v1209_v0 = vpop.permute.xlu0 %1208 }
 0x1d5   : > { %v750_v43 = vsel %vm743_vm8, %v2948_v8, %v740_v57  ;;  %v751_v25 = vsel %vm743_vm8, %v740_v57, %v742_v17  ;;  %v2954_v8 = vld [vmem:[#allocation4_spill] sm:$0xff] }
 0x1d8   : > { %v1203_v51 = vpop.permute.xlu1 %1202 }
 0x1d9   : > { %v1224_v58 = vsel %vm1222_vm12, %v2513_v26, %v1203_v51  ;;  %v2946_v26 = vld [vmem:[#allocation17_spill] sm:$0xff] }
 0x1da   : > { %v1240_v44 = vadd.f32 %v1224_v58, %v2569_v40  ;;  %v2719_v15 = vadd.f32 %v2946_v26, %v2557_v5 }
 0x1dc   : > { %v1321_v41 = vadd.f32 %v1313_v35, %v1240_v44  ;;  %v1207_v63 = vpop.permute.xlu1 %1206  ;;  %v2950_v35 = vld [vmem:[#allocation9_spill] sm:$0xff]  ;;  %v826_v44 = vsel %vm2528_vm11, %v810_v50, 0.0 }
 0x1dd   : > { %v1225_v29 = vsel %vm1222_vm12, %v1205_v3, %v1207_v63  ;;  %v1226_v4 = vsel %vm1222_vm12, %v1207_v63, %v1209_v0  ;;  %v2949_v3 = vld [vmem:[#allocation7_spill] sm:$0xff]  ;;  %v849_v18 = vmul.f32 %v2950_v35, %v825_v23  ;;  %v850_v57 = vmul.f32 %v2950_v35, %v826_v44  ;;  %v2955_v23 = vld [vmem:[#allocation12_spill] sm:$0xff] }
 0x1de   : > { %v1241_v40 = vadd.f32 %v1225_v29, %v2634_v48  ;;  %v1242_v52 = vadd.f32 %v1226_v4, %v2639_v28  ;;  %v2725_v22 = vadd.f32 %v2946_v26, %v1321_v41  ;;  %v625_v28 = vsel %vm618_vm1, %v1898_v33, %v615_v39  ;;  %v2951_v63 = vld [vmem:[#allocation3_spill] sm:$0xff] }
 0x1df   : > { %v641_v12 = vsel %vm2472_vm3, %v625_v28, 0.0  ;;  %v890_v39 = vsel %vm883_vm5, %v1918_v9, %v2687_v55  ;;  %v670_v61 = vmul.f32 %v2949_v3, %v642_v1  ;;  %v1936_v4 = vunpack.i.h.bf16 %v2387_v32 }
 0x1e0   : > { %v1322_v30 = vadd.f32 %v1314_v34, %v1241_v40  ;;  %v1323_v31 = vadd.f32 %v1315_v11, %v1242_v52  ;;  %v1360_v14 = vadd.f32 %v2725_v22, %v2719_v15  ;;  %v669_v62 = vmul.f32 %v2949_v3, %v641_v12 }
 0x1e1   : > { %v906_v0 = vsel %vm2472_vm3, %v890_v39, 0.0  ;;  %v767_v36 = vadd.f32 %v751_v25, %v670_v61  ;;  %v907_v34 = vsel %vm2521_vm10, %v891_v21, 0.0  ;;  %v1027_v26 = vsel %vm1020_vm4, %v2652_v56, %v2691_v46 }
 0x1e2   : > { %1361 = vadd.xlane.f32.xlu0 %v1360_v14  ;;  %v2730_v38 = vadd.f32 %v2947_v59, %v1322_v30  ;;  %v2733_v5 = vadd.f32 %v2947_v59, %v1323_v31  ;;  %v766_v51 = vadd.f32 %v750_v43, %v669_v62  ;;  %v930_v6 = vmul.f32 %v2951_v63, %v906_v0  ;;  %v2952_v14 = vld [vmem:[#allocation10_spill] sm:$0xff] }
 0x1e3   : > { %v858_v29 = vadd.f32 %v850_v57, %v767_v36  ;;  %v931_v52 = vmul.f32 %v2951_v63, %v907_v34  ;;  %v1028_v31 = vsel %vm1020_vm4, %v2691_v46, %v1936_v4  ;;  %v1108_v32 = vsel %vm1101_vm7, %v2667_v53, %v2693_v45  ;;  %v2953_v53 = vld [vmem:[#allocation13_spill] sm:$0xff] }
 0x1e4   : > { %v1363_v48 = vadd.f32 %v2733_v5, %v2730_v38  ;;  %v857_v41 = vadd.f32 %v849_v18, %v766_v51  ;;  %v962_v59 = vmul.f32 %v2952_v14, %v2381_v19  ;;  %v1043_v56 = vsel %vm2481_vm6, %v1027_v26, 0.0 }
 0x1e5   : > { %v2739_v16 = vpop.permute.xlu0 %1349  ;;  %v939_v33 = vadd.f32 %v931_v52, %v858_v29  ;;  %v1044_v46 = vsel %vm2528_vm11, %v1028_v31, 0.0  ;;  %v1124_v10 = vsel %vm2472_vm3, %v1108_v32, 0.0  ;;  %v963_v27 = vmul.f32 %v2952_v14, %v2953_v53 }
 0x1e6   : > { %1364 = vadd.xlane.f32.xlu1 %v1363_v48  ;;  %v938_v11 = vadd.f32 %v930_v6, %v857_v41  ;;  %v1943_v19 = vunpack.i.h.bf16 %v2941_v42  ;;  %v1067_v43 = vmul.f32 %v2954_v8, %v1043_v56  ;;  %v1068_v1 = vmul.f32 %v2954_v8, %v1044_v46  ;;  %v2956_v42 = vld [vmem:[#allocation8_spill] sm:$0xff] }
 0x1e7   : > { %v971_v62 = vadd.f32 %v963_v27, %v939_v33  ;;  %v1148_v50 = vmul.f32 %v2955_v23, %v1124_v10 }
 0x1e8   : > { %v970_v12 = vadd.f32 %v962_v59, %v938_v11  ;;  %v1109_v54 = vsel %vm1101_vm7, %v2693_v45, %v1943_v19 }
 0x1e9   : > { %v1262_v7 = vpop.permute.xlu0 %1261  ;;  %v1125_v45 = vsel %vm2521_vm10, %v1109_v54, 0.0  ;;  %v1076_v41 = vadd.f32 %v1068_v1, %v971_v62  ;;  %v1453_v62 = vld [vmem:[%s2893_s6 + $0x8] sm:$0xff]  ;;  %v1454_v1 = vld [vmem:[%s2893_s6 + $0x10] sm:$0xff]  ;;  %v1455_v54 = vld [vmem:[%s2893_s6 + $0x18] sm:$0xff] }
 0x1ea   : > { %v1075_v25 = vadd.f32 %v1067_v43, %v970_v12  ;;  %v1377_v43 = vld [vmem:[%s2892_s5] sm:$0xff] }
 0x1ec   : > { %v1156_v29 = vadd.f32 %v1148_v50, %v1075_v25 }
 0x1ed   : > { %v2758_v58 = vpop.permute.xlu1 %1344  ;;  %v1266_v24 = vpop.permute.xlu0 %1265 }
 0x1f1   : > { %v1260_v17 = vpop.permute.xlu1 %1259  ;;  %v1211_v40 = vpop.permute.xlu0 %1210 }
 0x1f2   : > { %v1276_v48 = vsel %vm1271_vm9, %v1260_v17, %v1262_v7 }
 0x1f3   : > { %v1292_v9 = vsel %vm2481_vm6, %v1276_v48, 0.0  ;;  %v2958_v48 = vmov 0.0  }
 0x1f4   : > { %v1316_v51 = vmul.f32 %v2956_v42, %v1292_v9  ;;  %1815 = vmatprep.mubr.msk.f32.mxu1 %vm1983_vm13, %v2958_v48  ;;  %v1452_v9 = vld [vmem:[%s2893_s6] sm:$0xff] }
 0x1f5   : > { %v1951_v55 = vpop.permute.xlu1 %1950  ;;  %v1215_v3 = vpop.permute.xlu0 %1214 }
 0x1f6   : > { %v1952_v30 = vunpack.i.l.bf16 %v1951_v55  ;;  %v1953_v61 = vunpack.i.h.bf16 %v1951_v55 }
 0x1f8   : > { %v1277_v28 = vsel %vm1271_vm9, %v1262_v7, %v1952_v30 }
 0x1f9   : > { %v1268_v37 = vpop.permute.xlu1 %1267  ;;  %v1293_v7 = vsel %vm2528_vm11, %v1277_v28, 0.0  ;;  %v1219_v57 = vpop.permute.xlu0 %1218 }
 0x1fa   : > { %v1278_v44 = vsel %vm1271_vm9, %v1266_v24, %v1268_v37  ;;  %v1317_v36 = vmul.f32 %v2956_v42, %v1293_v7  ;;  %v1279_v17 = vsel %vm1271_vm9, %v1268_v37, %v1953_v61 }
 0x1fb   : > { %v1294_v24 = vsel %vm2481_vm6, %v1278_v44, 0.0  ;;  %v1295_v11 = vsel %vm2528_vm11, %v1279_v17, 0.0 }
 0x1fd   : > { %v1213_v39 = vpop.permute.xlu1 %1212 }
 0x1fe   : > { %v1227_v35 = vsel %vm1222_vm12, %v1211_v40, %v1213_v39  ;;  %v1228_v18 = vsel %vm1222_vm12, %v1213_v39, %v1215_v3  ;;  %v2957_v40 = vld [vmem:[#allocation14_spill] sm:$0xff] }
 0x1ff   : > { %v1243_v0 = vadd.f32 %v1227_v35, %v2677_v49  ;;  %v1244_v21 = vadd.f32 %v1228_v18, %v2689_v60  ;;  %v1149_v60 = vmul.f32 %v2955_v23, %v1125_v45  ;;  %v1318_v55 = vmul.f32 %v2957_v40, %v1294_v24 }
 0x200   : > { %v1319_v32 = vmul.f32 %v2957_v40, %v1295_v11 }
 0x201   : > { %v1324_v63 = vadd.f32 %v1316_v51, %v1243_v0  ;;  %v1325_v6 = vadd.f32 %v1317_v36, %v1244_v21  ;;  %v1217_v34 = vpop.permute.xlu1 %1216  ;;  %v1157_v30 = vadd.f32 %v1149_v60, %v1076_v41 }
 0x202   : > { %v1229_v49 = vsel %vm1222_vm12, %v1217_v34, %v1219_v57 }
 0x203   : > { %v1245_v4 = vadd.f32 %v1229_v49, %v1156_v29  ;;  %v2820_v26 = vadd.f32 %v2758_v58, %v1324_v63  ;;  %v2823_v2 = vadd.f32 %v2758_v58, %v1325_v6  ;;  %v1635_v63 = vld [vmem:[%s2895_s8] sm:$0xff] }
 0x205   : > { %v1221_v52 = vpop.permute.xlu1 %1220  ;;  %v1366_v47 = vadd.f32 %v2823_v2, %v2820_v26  ;;  %v1326_v14 = vadd.f32 %v1318_v55, %v1245_v4 }
 0x206   : > { %v1230_v31 = vsel %vm1222_vm12, %v1219_v57, %v1221_v52 }
 0x207   : > { %v1246_v59 = vadd.f32 %v1230_v31, %v1157_v30  ;;  %1367 = vadd.xlane.f32.xlu0 %v1366_v47  ;;  %v2833_v58 = vadd.f32 %v2739_v16, %v1326_v14 }
 0x209   : > { %v1327_v56 = vadd.f32 %v1319_v32, %v1246_v59 }
 0x20b   : > { %v2836_v20 = vadd.f32 %v2739_v16, %v1327_v56 }
 0x20d   : > { %v1369_v33 = vadd.f32 %v2836_v20, %v2833_v58 }
 0x20f   : > { %1370 = vadd.xlane.f32.xlu0 %v1369_v33 }
 0x26f   : > { %v1362_v28 = vpop.xlane.xlu0 %1361 }
 0x270   : > { %v1373_v12 = vmul.f32 0.00390625, %v1362_v28 }
 0x273   : > { %v1365_v37 = vpop.xlane.xlu1 %1364 }
 0x274   : > { %v1374_v46 = vmul.f32 0.00390625, %v1365_v37 }
 0x276   : > { %v1827_v10 = vpack.c.bf16 %v1374_v46, %v1373_v12 }
 0x278   : > { %1828 = vmatpush3.bf16.msra.mxu1 %v1827_v10 }
 0x279   : > { %1829 = vmatprep.subr.bf16.mxu1 %v1982_v13 }
 0x294   : > { %v1368_v53 = vpop.xlane.xlu0 %1367 }
 0x295   : > { %v1375_v19 = vmul.f32 0.00390625, %v1368_v53 }
 0x29c   : > { %v1371_v27 = vpop.xlane.xlu0 %1370 }
 0x29d   : > { %v1376_v16 = vmul.f32 0.00390625, %v1371_v27 }
 0x29f   : > { %v1830_v8 = vpack.c.bf16 %v1376_v16, %v1375_v19 }
 0x2a1   : > { %1831 = vmatpush3.bf16.msra.mxu1 %v1830_v8 }
 0x2a4   : > { %1816 = vmatmul.mubr.msk.f32.vlgmr.msra.gmra.mrb[0].mxu1 %vm1378_vm14, %v1377_v43 }
 0x2a5   : > { %1820 = vmatprep.mubr.msk.f32.mxu1 %vm363_vm0, %v1452_v9 }
 0x377   : > { %v1448_v13 = vpop.f32.mrb[0].mxu1 }
 0x378   : > { %v1456_v3 = vmax.f32 %v1448_v13, 0.0  ;;  %v1817_v7 = vpop.f32.mrb[1].mxu1 }
 0x37a   : > { %1818 = vmatprep.subr.mxu1 %v1456_v3 }
 0x37b   : > { %1819 = vmatpush3.msra.mxu1 %v1456_v3 }
 0x37c   : > { %1821 = vmatmul.mubr.msk.f32.vlgmr.msra.gmra.mrb[2].mxu1 %vm363_vm0, %v1453_v62 }
 0x37d   : > { %1823 = vmatprep.mubr.msk.f32.mxu1 %vm363_vm0, %v1454_v1 }
 0x380   : > { %1824 = vmatmul.mubr.msk.f32.gmra.mrb[4].mxu1 %vm363_vm0, %v1455_v54 }
 0x44f   : > { %v1822_v23 = vpop.f32.mrb[2].mxu1 }
 0x450   : > { %v1541_v50 = vadd.f32 3.0, %v1822_v23  ;;  %v1535_v39 = vpop.f32.mrb[3].mxu1 }
 0x451   : > { %v1536_v25 = vadd.f32 3.0, %v1535_v39 }
 0x452   : > { %v1555_v42 = vmax.f32 %v1541_v50, 0.0 }
 0x453   : > { %v1554_v51 = vmax.f32 %v1536_v25, 0.0  ;;  %v1825_v61 = vpop.f32.mrb[4].mxu1 }
 0x454   : > { %v1559_v35 = vmin.f32 %v1555_v42, 6.0  ;;  %v1551_v18 = vadd.f32 3.0, %v1825_v61  ;;  %v1545_v44 = vpop.f32.mrb[5].mxu1 }
 0x455   : > { %v1558_v0 = vmin.f32 %v1554_v51, 6.0  ;;  %v1546_v21 = vadd.f32 3.0, %v1545_v44 }
 0x456   : > { %v1563_v36 = vmul.f32 0.16666667, %v1559_v35  ;;  %v1557_v41 = vmax.f32 %v1551_v18, 0.0 }
 0x457   : > { %v1562_v45 = vmul.f32 0.16666667, %v1558_v0  ;;  %v1556_v17 = vmax.f32 %v1546_v21, 0.0 }
 0x458   : > { %1573 = vperm.xlu0 %1937, %v1563_v36   ;;  %v1561_v6 = vmin.f32 %v1557_v41, 6.0 }
 0x459   : > { %v1560_v57 = vmin.f32 %v1556_v17, 6.0  ;;  %1568 = vperm.xlu1 %1938, %v1562_v45   ;;  %v1634_v45 = vld [vmem:[%s2894_s7] sm:$0xff] }
 0x45a   : > { %v1565_v29 = vmul.f32 0.16666667, %v1561_v6 }
 0x45b   : > { %v1564_v34 = vmul.f32 0.16666667, %v1560_v57 }
 0x45c   : > { %1638 = vperm.xlu0 %1937, %v1635_v63  }
 0x45d   : > { %1578 = vperm.xlu1 %1938, %v1564_v34   ;;  %v1954_v34 = vld [vmem:[%s2069_s22] sm:$0xff] }
 0x461   : > { %1583 = vperm.xlu1 %1938, %v1565_v29  }
 0x4d7   : > { %v1574_v24 = vpop.permute.xlu0 %1573 }
 0x4d8   : > { %v1588_v49 = vmul.f32 %v1574_v24, %v2730_v38  ;;  %v1589_v60 = vmul.f32 %v1574_v24, %v2733_v5  ;;  %v1569_v4 = vpop.permute.xlu1 %1568  ;;  %v1955_v24 = vld [vmem:[%s2069_s22 + $0x8] sm:$0xff] }
 0x4d9   : > { %v1586_v11 = vmul.f32 %v1569_v4, %v2719_v15  ;;  %v1587_v40 = vmul.f32 %v1569_v4, %v2725_v22 }
 0x4da   : > { %v1596_v55 = vadd.f32 3.0, %v1588_v49  ;;  %v1597_v52 = vadd.f32 3.0, %v1589_v60 }
 0x4db   : > { %v1594_v30 = vadd.f32 3.0, %v1586_v11  ;;  %v1595_v47 = vadd.f32 3.0, %v1587_v40  ;;  %v1639_v41 = vpop.permute.xlu0 %1638 }
 0x4dc   : > { %v1604_v31 = vmax.f32 %v1596_v55, 0.0  ;;  %v1605_v32 = vmax.f32 %v1597_v52, 0.0  ;;  %v1579_v14 = vpop.permute.xlu1 %1578 }
 0x4dd   : > { %v1602_v59 = vmax.f32 %v1594_v30, 0.0  ;;  %v1603_v56 = vmax.f32 %v1595_v47, 0.0  ;;  %v1590_v33 = vmul.f32 %v1579_v14, %v2820_v26  ;;  %v1591_v38 = vmul.f32 %v1579_v14, %v2823_v2 }
 0x4de   : > { %v1612_v48 = vmin.f32 %v1604_v31, 6.0  ;;  %v1613_v5 = vmin.f32 %v1605_v32, 6.0 }
 0x4df   : > { %v1610_v28 = vmin.f32 %v1602_v59, 6.0  ;;  %v1611_v37 = vmin.f32 %v1603_v56, 6.0  ;;  %v1598_v15 = vadd.f32 3.0, %v1590_v33  ;;  %v1599_v12 = vadd.f32 3.0, %v1591_v38 }
 0x4e0   : > { %v1620_v22 = vmul.f32 0.16666667, %v1612_v48  ;;  %v1621_v46 = vmul.f32 0.16666667, %v1613_v5  ;;  %v1584_v10 = vpop.permute.xlu1 %1583 }
 0x4e1   : > { %v1618_v53 = vmul.f32 0.16666667, %v1610_v28  ;;  %v1619_v27 = vmul.f32 0.16666667, %v1611_v37  ;;  %v1606_v19 = vmax.f32 %v1598_v15, 0.0  ;;  %v1607_v16 = vmax.f32 %v1599_v12, 0.0 }
 0x4e2   : > { %v1628_v8 = vmul.f32 %v1620_v22, %v1588_v49  ;;  %v1629_v43 = vmul.f32 %v1621_v46, %v1589_v60  ;;  %v1592_v9 = vmul.f32 %v1584_v10, %v2833_v58  ;;  %v1593_v26 = vmul.f32 %v1584_v10, %v2836_v20 }
 0x4e3   : > { %v1626_v2 = vmul.f32 %v1618_v53, %v1586_v11  ;;  %v1627_v13 = vmul.f32 %v1619_v27, %v1587_v40  ;;  %v1614_v3 = vmin.f32 %v1606_v19, 6.0  ;;  %v1615_v7 = vmin.f32 %v1607_v16, 6.0 }
 0x4e4   : > { %v1600_v62 = vadd.f32 3.0, %v1592_v9  ;;  %v1601_v1 = vadd.f32 3.0, %v1593_v26 }
 0x4e5   : > { %v1834_v54 = vpack.c.bf16 %v1628_v8, %v1626_v2  ;;  %v1832_v23 = vpack.c.bf16 %v1629_v43, %v1627_v13  ;;  %v1622_v25 = vmul.f32 0.16666667, %v1614_v3  ;;  %v1623_v42 = vmul.f32 0.16666667, %v1615_v7 }
 0x4e6   : > { %v1608_v50 = vmax.f32 %v1600_v62, 0.0  ;;  %v1609_v39 = vmax.f32 %v1601_v1, 0.0 }
 0x4e7   : > { %1833 = vmatprep.subr.bf16.mxu0 %v1832_v23  ;;  %v1630_v20 = vmul.f32 %v1622_v25, %v1590_v33  ;;  %v1631_v18 = vmul.f32 %v1623_v42, %v1591_v38 }
 0x4e8   : > { %v1616_v51 = vmin.f32 %v1608_v50, 6.0  ;;  %v1617_v61 = vmin.f32 %v1609_v39, 6.0  ;;  %1835 = vmatpush1.bf16.msra.mxu0 %v1834_v54 }
 0x4ea   : > { %v1624_v35 = vmul.f32 0.16666667, %v1616_v51  ;;  %v1625_v58 = vmul.f32 0.16666667, %v1617_v61 }
 0x4ec   : > { %v1632_v44 = vmul.f32 %v1624_v35, %v1592_v9  ;;  %v1633_v0 = vmul.f32 %v1625_v58, %v1593_v26 }
 0x4ee   : > { %v1838_v21 = vpack.c.bf16 %v1632_v44, %v1630_v20  ;;  %v1836_v36 = vpack.c.bf16 %v1633_v0, %v1631_v18 }
 0x4f0   : > { %1837 = vmatprep.subr.bf16.mxu0 %v1836_v36 }
 0x4f1   : > { %1839 = vmatpush1.bf16.msra.mxu0 %v1838_v21 }
 0x4f4   : > { %1792 = vmatmul.mubr.msk.f32.vlgmr.msra.gmra.mrb[8].mxu0 %vm1378_vm14, %v1634_v45 }
 0x5c7   : > { %v1710_v17 = vpop.f32.mrb[8].mxu0 }
 0x5c8   : > { %v1711_v57 = vadd.f32 %v1710_v17, %v1639_v41  ;;  %v1712_v63 = vpop.f32.mrb[9].mxu0 }
 0x5c9   : > { %v1713_v6 = vadd.f32 %v1712_v63, %v1639_v41 }
 0x5ca   : > { %v1715_v29 = vadd.f32 %v1954_v34, %v1711_v57 }
 0x5cb   : > { %v1716_v49 = vadd.f32 %v1955_v24, %v1713_v6 }
 0x5cc   : > { %1717 = vst [vmem:[%s332_s18] sm:$0xff] %v1715_v29 }
 0x5cd   : > { %1718 = vst [vmem:[%s332_s18 + $0x8] sm:$0xff] %v1716_v49 }
 0x5ce PF: > { %s19_s30 = sadd.s32 1, %s1962_s30  }
 0x5cf   : > { %p16_p4 = scmp.ge.s32.totalorder %s19_s30, 4  }
 0x5d1   :  { %18 = sbr.rel (!%p16_p4) target bundleno = 1 (0x1), region = 86 }

</bundles_post_ra>
